<compile_context>
chip_gen: v7x
topology: tpu7x:2x2x1
jax: 0.10.0
libtpu: 0.0.40
codegen_flags: <defaults>
</compile_context>

<pallas_src>
import jax
import jax.numpy as jnp
from jax.experimental import pallas as pl
from jax.experimental.pallas import tpu as pltpu


# Feature dims (padded to lane-friendly multiples of 128 where internal).
D_IN = 784      # true I/O edge, kept as-is
D_H1 = 512      # 400 -> 512
D_H2 = 128      # 100 -> 128
D_LAT = 2       # latent width (mu / logvar each)
D_MLV = 4       # packed [mu | logvar]


def vae_kernel(
    x_ref, eps_ref,
    w1_ref, b1_ref, w1b_ref, b1b_ref,
    w2_ref, b2_ref, w3_ref, b3_ref,
    w3b_ref, b3b_ref, w4_ref, b4_ref,
    recon_ref, mulv_ref,
):
    f32 = jnp.float32
    bf16 = jnp.bfloat16

    x = x_ref[...].astype(bf16)                                       # (TB, 784)

    # ---- encode (bf16 matmuls, f32 accumulate, f32 elementwise) ----
    h1 = jnp.dot(x, w1_ref[...], preferred_element_type=f32) + b1_ref[...]
    h1 = jnp.maximum(h1, 0.0)                                         # (TB, 512)
    h1 = jnp.dot(h1.astype(bf16), w1b_ref[...],
                 preferred_element_type=f32) + b1b_ref[...]
    h1 = jnp.maximum(h1, 0.0)                                         # (TB, 128)

    # fused mu/logvar projection (tiny -> f32)
    y2 = jnp.dot(h1, w2_ref[...], preferred_element_type=f32) + b2_ref[...]  # (TB, 4)
    mulv_ref[...] = y2                                                # packed [mu | logvar]

    # ---- reparameterize ----
    mu = y2[:, 0:D_LAT]
    logvar = y2[:, D_LAT:D_MLV]
    z = mu + eps_ref[...] * jnp.exp(0.5 * logvar)                     # (TB, 2)

    # ---- decode ----
    h3 = jnp.dot(z, w3_ref[...], preferred_element_type=f32) + b3_ref[...]
    h3 = jnp.maximum(h3, 0.0)                                         # (TB, 128)
    h3 = jnp.dot(h3.astype(bf16), w3b_ref[...],
                 preferred_element_type=f32) + b3b_ref[...]
    h3 = jnp.maximum(h3, 0.0)                                         # (TB, 512)
    logits = jnp.dot(h3.astype(bf16), w4_ref[...],
                     preferred_element_type=f32) + b4_ref[...]        # (TB, 784)
    recon_ref[...] = jax.nn.sigmoid(logits)


# ----------------------------- parameters ------------------------------------

def init_linear(key, in_dim, out_dim):
    """PyTorch-style init U(-1/sqrt(in), 1/sqrt(in)); W pre-transposed to (in,out)."""
    kw, kb = jax.random.split(key)
    bound = 1.0 / jnp.sqrt(jnp.float32(in_dim))
    w = jax.random.uniform(kw, (in_dim, out_dim), jnp.float32, -bound, bound)
    b = jax.random.uniform(kb, (1, out_dim), jnp.float32, -bound, bound)
    return w, b


def make_params(seed=0):
    keys = jax.random.split(jax.random.PRNGKey(seed), 7)
    return {
        "fc1": init_linear(keys[0], 784, 400),
        "fc1b": init_linear(keys[1], 400, 100),
        "fc21": init_linear(keys[2], 100, 2),
        "fc22": init_linear(keys[3], 100, 2),
        "fc3": init_linear(keys[4], 2, 100),
        "fc3b": init_linear(keys[5], 100, 400),
        "fc4": init_linear(keys[6], 400, 784),
    }


def _pad2(a, rows, cols):
    return jnp.pad(a, ((0, rows - a.shape[0]), (0, cols - a.shape[1])))


def pad_params(params):
    """Zero-pad features to lane-friendly sizes; large matmul weights -> bf16."""
    w1, b1 = params["fc1"]
    w1b, b1b = params["fc1b"]
    w21, b21 = params["fc21"]
    w22, b22 = params["fc22"]
    w3, b3 = params["fc3"]
    w3b, b3b = params["fc3b"]
    w4, b4 = params["fc4"]

    # fuse fc21 | fc22 into one (100, 4) projection, then pad rows to 128
    w2 = jnp.concatenate([w21, w22], axis=1)
    b2 = jnp.concatenate([b21, b22], axis=1)

    return dict(
        w1=_pad2(w1, D_IN, D_H1).astype(jnp.bfloat16), b1=_pad2(b1, 1, D_H1),
        w1b=_pad2(w1b, D_H1, D_H2).astype(jnp.bfloat16), b1b=_pad2(b1b, 1, D_H2),
        w2=_pad2(w2, D_H2, D_MLV), b2=b2,                       # tiny, keep f32
        w3=_pad2(w3, D_LAT, D_H2), b3=_pad2(b3, 1, D_H2),        # tiny, keep f32
        w3b=_pad2(w3b, D_H2, D_H1).astype(jnp.bfloat16), b3b=_pad2(b3b, 1, D_H1),
        w4=_pad2(w4, D_H1, D_IN).astype(jnp.bfloat16), b4=b4,
    )


# ------------------------------- wrapper --------------------------------------

def _round_up(x, m):
    return (x + m - 1) // m * m


@jax.jit
def vae_forward(x, eps, kparams):
    """x: anything reshapeable to (-1, 784) (e.g. (B,1,28,28)); eps: (B, 2) noise."""
    x2d = x.reshape(-1, D_IN).astype(jnp.float32)
    B = x2d.shape[0]

    # batch tile: multiple of 8 (sublane), capped at 256 (fills MXU M on v6e/v7x)
    TB = min(256, _round_up(B, 8))
    Bp = _round_up(B, TB)
    if Bp != B:
        x2d = jnp.pad(x2d, ((0, Bp - B), (0, 0)))
        eps = jnp.pad(eps, ((0, Bp - B), (0, 0)))
    grid = (Bp // TB,)

    p = kparams
    weight_args = (p["w1"], p["b1"], p["w1b"], p["b1b"], p["w2"], p["b2"],
                   p["w3"], p["b3"], p["w3b"], p["b3b"], p["w4"], p["b4"])

    def resident(a):  # full-array block, VMEM-resident across all batch tiles
        return pl.BlockSpec(a.shape, lambda i: (0, 0))

    in_specs = [
        pl.BlockSpec((TB, D_IN), lambda i: (i, 0)),     # x tile
        pl.BlockSpec((TB, D_LAT), lambda i: (i, 0)),    # eps tile
    ] + [resident(a) for a in weight_args]

    out_specs = (
        pl.BlockSpec((TB, D_IN), lambda i: (i, 0)),     # recon tile
        pl.BlockSpec((TB, D_MLV), lambda i: (i, 0)),    # packed [mu | logvar] tile
    )

    param_bytes = int(sum(a.size * a.dtype.itemsize for a in weight_args))
    cost = pl.CostEstimate(
        flops=2 * Bp * (784 * 400 + 400 * 100 + 100 * 4 + 2 * 100
                        + 100 * 400 + 400 * 784),
        transcendentals=Bp * (2 + 784),
        bytes_accessed=Bp * (D_IN + D_LAT + D_IN + D_MLV) * 4 + param_bytes,
    )

    recon_p, mulv_p = pl.pallas_call(
        vae_kernel,
        grid=grid,
        out_shape=(
            jax.ShapeDtypeStruct((Bp, D_IN), jnp.float32),
            jax.ShapeDtypeStruct((Bp, D_MLV), jnp.float32),
        ),
        in_specs=in_specs,
        out_specs=out_specs,
        compiler_params=pltpu.CompilerParams(
            dimension_semantics=("parallel",),
            vmem_limit_bytes=32 << 20,
        ),
        cost_estimate=cost,
    )(x2d, eps, *weight_args)

    recon = recon_p[:B]
    mu = mulv_p[:B, 0:D_LAT]
    logvar = mulv_p[:B, D_LAT:D_MLV]
    return recon, mu, logvar


# ------------------------------ reference -------------------------------------

def vae_forward_ref(x, eps, params):
    """Pure-JAX reference mirroring the kernel's bf16-matmul / f32-accumulate math."""
    x2d = x.reshape(-1, D_IN).astype(jnp.float32)

    def lin_bf16(h, p):
        w, b = p
        return jnp.dot(h.astype(jnp.bfloat16), w.astype(jnp.bfloat16),
                       preferred_element_type=jnp.float32) + b

    def lin_f32(h, p):
        w, b = p
        return jnp.dot(h, w, preferred_element_type=jnp.float32) + b

    h1 = jax.nn.relu(lin_bf16(x2d, params["fc1"]))
    h1 = jax.nn.relu(lin_bf16(h1, params["fc1b"]))
    mu = lin_f32(h1, params["fc21"])
    logvar = lin_f32(h1, params["fc22"])
    z = mu + eps * jnp.exp(0.5 * logvar)
    h3 = jax.nn.relu(lin_f32(z, params["fc3"]))
    h3 = jax.nn.relu(lin_bf16(h3, params["fc3b"]))
    recon = jax.nn.sigmoid(lin_bf16(h3, params["fc4"]))
    return recon, mu, logvar


if __name__ == "__main__":
    key = jax.random.PRNGKey(0)
    kx, keps = jax.random.split(key)

    params = make_params(seed=0)
    kparams = pad_params(params)

    # Small demo batch (grid = 1 tile).
    B = 8
    x = jax.random.normal(kx, (B, 1, 28, 28), jnp.float32)   # NCHW, torch .view(-1,784)
    eps = jax.random.normal(keps, (B, 2), jnp.float32)

    recon, mu, logvar = vae_forward(x, eps, kparams)
    jax.block_until_ready((recon, mu, logvar))

    r_ref, mu_ref, lv_ref = vae_forward_ref(x, eps, params)
    assert recon.shape == (B, 784) and mu.shape == (B, 2) and logvar.shape == (B, 2)
    assert jnp.allclose(recon, r_ref, atol=2e-3, rtol=2e-3)
    assert jnp.allclose(mu, mu_ref, atol=2e-3, rtol=2e-3)
    assert jnp.allclose(logvar, lv_ref, atol=2e-3, rtol=2e-3)

    # Larger, non-multiple batch: exercises batch tiling (grid > 1) + padding path.
    B2 = 300
    kx2, keps2 = jax.random.split(jax.random.PRNGKey(1))
    x2 = jax.random.normal(kx2, (B2, 1, 28, 28), jnp.float32)
    eps2 = jax.random.normal(keps2, (B2, 2), jnp.float32)
    recon2, mu2, logvar2 = vae_forward(x2, eps2, kparams)
    jax.block_until_ready((recon2, mu2, logvar2))
    r2_ref, mu2_ref, lv2_ref = vae_forward_ref(x2, eps2, params)
    assert recon2.shape == (B2, 784) and mu2.shape == (B2, 2)
    assert jnp.allclose(recon2, r2_ref, atol=2e-3, rtol=2e-3)
    assert jnp.allclose(mu2, mu2_ref, atol=2e-3, rtol=2e-3)
    assert jnp.allclose(logvar2, lv2_ref, atol=2e-3, rtol=2e-3)

    print("KERNEL_OK")
</pallas_src>

<mosaic_0001>
module attributes {stable_mosaic.version = 11 : i64} {
  func.func @vae_kernel(%arg0: i32, %arg1: memref<8x784xf32, #tpu.memory_space<vmem>>, %arg2: memref<8x2xf32, #tpu.memory_space<vmem>>, %arg3: memref<784x512xbf16, #tpu.memory_space<vmem>>, %arg4: memref<1x512xf32, #tpu.memory_space<vmem>>, %arg5: memref<512x128xbf16, #tpu.memory_space<vmem>>, %arg6: memref<1x128xf32, #tpu.memory_space<vmem>>, %arg7: memref<128x4xf32, #tpu.memory_space<vmem>>, %arg8: memref<1x4xf32, #tpu.memory_space<vmem>>, %arg9: memref<2x128xf32, #tpu.memory_space<vmem>>, %arg10: memref<1x128xf32, #tpu.memory_space<vmem>>, %arg11: memref<128x512xbf16, #tpu.memory_space<vmem>>, %arg12: memref<1x512xf32, #tpu.memory_space<vmem>>, %arg13: memref<512x784xbf16, #tpu.memory_space<vmem>>, %arg14: memref<1x784xf32, #tpu.memory_space<vmem>>, %arg15: memref<8x784xf32, #tpu.memory_space<vmem>>, %arg16: memref<8x4xf32, #tpu.memory_space<vmem>>) attributes {dimension_semantics = [#tpu.dimension_semantics<parallel>], iteration_bounds = array<i64: 1>, scalar_prefetch = 0 : i64, scratch_operands = 0 : i64, tpu.core_type = #tpu.core_type<tc>, window_params = [{transform_indices = @transform_0, window_bounds = array<i64: 8, 784>}, {transform_indices = @transform_1, window_bounds = array<i64: 8, 2>}, {pipeline_mode = #tpu.pipeline_mode<synchronous>, transform_indices = @transform_2, window_bounds = array<i64: 784, 512>}, {pipeline_mode = #tpu.pipeline_mode<synchronous>, transform_indices = @transform_3, window_bounds = array<i64: 1, 512>}, {pipeline_mode = #tpu.pipeline_mode<synchronous>, transform_indices = @transform_4, window_bounds = array<i64: 512, 128>}, {pipeline_mode = #tpu.pipeline_mode<synchronous>, transform_indices = @transform_5, window_bounds = array<i64: 1, 128>}, {pipeline_mode = #tpu.pipeline_mode<synchronous>, transform_indices = @transform_6, window_bounds = array<i64: 128, 4>}, {pipeline_mode = #tpu.pipeline_mode<synchronous>, transform_indices = @transform_7, window_bounds = array<i64: 1, 4>}, {pipeline_mode = #tpu.pipeline_mode<synchronous>, transform_indices = @transform_8, window_bounds = array<i64: 2, 128>}, {pipeline_mode = #tpu.pipeline_mode<synchronous>, transform_indices = @transform_9, window_bounds = array<i64: 1, 128>}, {pipeline_mode = #tpu.pipeline_mode<synchronous>, transform_indices = @transform_10, window_bounds = array<i64: 128, 512>}, {pipeline_mode = #tpu.pipeline_mode<synchronous>, transform_indices = @transform_11, window_bounds = array<i64: 1, 512>}, {pipeline_mode = #tpu.pipeline_mode<synchronous>, transform_indices = @transform_12, window_bounds = array<i64: 512, 784>}, {pipeline_mode = #tpu.pipeline_mode<synchronous>, transform_indices = @transform_13, window_bounds = array<i64: 1, 784>}, {transform_indices = @transform_14, window_bounds = array<i64: 8, 784>}, {transform_indices = @transform_15, window_bounds = array<i64: 8, 4>}]} {
    %c0 = arith.constant 0 : index
    %c0_0 = arith.constant 0 : index
    %0 = vector.load %arg1[%c0, %c0_0] : memref<8x784xf32, #tpu.memory_space<vmem>>, vector<8x784xf32>
    %1 = arith.truncf %0 : vector<8x784xf32> to vector<8x784xbf16>
    %c0_1 = arith.constant 0 : index
    %c0_2 = arith.constant 0 : index
    %2 = vector.load %arg3[%c0_1, %c0_2] : memref<784x512xbf16, #tpu.memory_space<vmem>>, vector<784x512xbf16>
    %cst = arith.constant dense<0.000000e+00> : vector<8x512xf32>
    %3 = tpu.matmul %1, %2, %cst {dimension_numbers = #tpu.dot_dimension_numbers<[1], [0], [0], [1], [0, 0, 1, 1], [], []>} : vector<8x784xbf16>, vector<784x512xbf16>, vector<8x512xf32> -> vector<8x512xf32>
    %c0_3 = arith.constant 0 : index
    %c0_4 = arith.constant 0 : index
    %4 = vector.load %arg4[%c0_3, %c0_4] : memref<1x512xf32, #tpu.memory_space<vmem>>, vector<1x512xf32>
    %5 = vector.broadcast %4 : vector<1x512xf32> to vector<8x512xf32>
    %6 = arith.addf %3, %5 : vector<8x512xf32>
    %cst_5 = arith.constant 0.000000e+00 : f32
    %7 = vector.broadcast %cst_5 : f32 to vector<8x512xf32>
    %8 = arith.maximumf %6, %7 : vector<8x512xf32>
    %9 = arith.truncf %8 : vector<8x512xf32> to vector<8x512xbf16>
    %c0_6 = arith.constant 0 : index
    %c0_7 = arith.constant 0 : index
    %10 = vector.load %arg5[%c0_6, %c0_7] : memref<512x128xbf16, #tpu.memory_space<vmem>>, vector<512x128xbf16>
    %cst_8 = arith.constant dense<0.000000e+00> : vector<8x128xf32>
    %11 = tpu.matmul %9, %10, %cst_8 {dimension_numbers = #tpu.dot_dimension_numbers<[1], [0], [0], [1], [0, 0, 1, 1], [], []>} : vector<8x512xbf16>, vector<512x128xbf16>, vector<8x128xf32> -> vector<8x128xf32>
    %c0_9 = arith.constant 0 : index
    %c0_10 = arith.constant 0 : index
    %12 = vector.load %arg6[%c0_9, %c0_10] : memref<1x128xf32, #tpu.memory_space<vmem>>, vector<1x128xf32>
    %13 = vector.broadcast %12 : vector<1x128xf32> to vector<8x128xf32>
    %14 = arith.addf %11, %13 : vector<8x128xf32>
    %cst_11 = arith.constant 0.000000e+00 : f32
    %15 = vector.broadcast %cst_11 : f32 to vector<8x128xf32>
    %16 = arith.maximumf %14, %15 : vector<8x128xf32>
    %c0_12 = arith.constant 0 : index
    %c0_13 = arith.constant 0 : index
    %17 = vector.load %arg7[%c0_12, %c0_13] : memref<128x4xf32, #tpu.memory_space<vmem>>, vector<128x4xf32>
    %cst_14 = arith.constant dense<0.000000e+00> : vector<8x4xf32>
    %18 = tpu.matmul %16, %17, %cst_14 {dimension_numbers = #tpu.dot_dimension_numbers<[1], [0], [0], [1], [0, 0, 1, 1], [], []>} : vector<8x128xf32>, vector<128x4xf32>, vector<8x4xf32> -> vector<8x4xf32>
    %c0_15 = arith.constant 0 : index
    %c0_16 = arith.constant 0 : index
    %19 = vector.load %arg8[%c0_15, %c0_16] : memref<1x4xf32, #tpu.memory_space<vmem>>, vector<1x4xf32>
    %20 = vector.broadcast %19 : vector<1x4xf32> to vector<8x4xf32>
    %21 = arith.addf %18, %20 : vector<8x4xf32>
    %c0_17 = arith.constant 0 : index
    %c0_18 = arith.constant 0 : index
    %22 = vector.load %arg16[%c0_17, %c0_18] : memref<8x4xf32, #tpu.memory_space<vmem>>, vector<8x4xf32>
    tpu.vector_store %arg16[%c0_17, %c0_18], %21 {strides = array<i32>} : memref<8x4xf32, #tpu.memory_space<vmem>>, vector<8x4xf32>,
    %23 = vector.extract_strided_slice %21 {offsets = [0, 0], sizes = [8, 2], strides = [1, 1]} : vector<8x4xf32> to vector<8x2xf32>
    %24 = vector.extract_strided_slice %21 {offsets = [0, 2], sizes = [8, 2], strides = [1, 1]} : vector<8x4xf32> to vector<8x2xf32>
    %c0_19 = arith.constant 0 : index
    %c0_20 = arith.constant 0 : index
    %25 = vector.load %arg2[%c0_19, %c0_20] : memref<8x2xf32, #tpu.memory_space<vmem>>, vector<8x2xf32>
    %cst_21 = arith.constant 5.000000e-01 : f32
    %26 = vector.broadcast %cst_21 : f32 to vector<8x2xf32>
    %27 = arith.mulf %26, %24 : vector<8x2xf32>
    %28 = math.exp %27 : vector<8x2xf32>
    %29 = arith.mulf %25, %28 : vector<8x2xf32>
    %30 = arith.addf %23, %29 : vector<8x2xf32>
    %c0_22 = arith.constant 0 : index
    %c0_23 = arith.constant 0 : index
    %31 = vector.load %arg9[%c0_22, %c0_23] : memref<2x128xf32, #tpu.memory_space<vmem>>, vector<2x128xf32>
    %cst_24 = arith.constant dense<0.000000e+00> : vector<8x128xf32>
    %32 = tpu.matmul %30, %31, %cst_24 {dimension_numbers = #tpu.dot_dimension_numbers<[1], [0], [0], [1], [0, 0, 1, 1], [], []>} : vector<8x2xf32>, vector<2x128xf32>, vector<8x128xf32> -> vector<8x128xf32>
    %c0_25 = arith.constant 0 : index
    %c0_26 = arith.constant 0 : index
    %33 = vector.load %arg10[%c0_25, %c0_26] : memref<1x128xf32, #tpu.memory_space<vmem>>, vector<1x128xf32>
    %34 = vector.broadcast %33 : vector<1x128xf32> to vector<8x128xf32>
    %35 = arith.addf %32, %34 : vector<8x128xf32>
    %cst_27 = arith.constant 0.000000e+00 : f32
    %36 = vector.broadcast %cst_27 : f32 to vector<8x128xf32>
    %37 = arith.maximumf %35, %36 : vector<8x128xf32>
    %38 = arith.truncf %37 : vector<8x128xf32> to vector<8x128xbf16>
    %c0_28 = arith.constant 0 : index
    %c0_29 = arith.constant 0 : index
    %39 = vector.load %arg11[%c0_28, %c0_29] : memref<128x512xbf16, #tpu.memory_space<vmem>>, vector<128x512xbf16>
    %cst_30 = arith.constant dense<0.000000e+00> : vector<8x512xf32>
    %40 = tpu.matmul %38, %39, %cst_30 {dimension_numbers = #tpu.dot_dimension_numbers<[1], [0], [0], [1], [0, 0, 1, 1], [], []>} : vector<8x128xbf16>, vector<128x512xbf16>, vector<8x512xf32> -> vector<8x512xf32>
    %c0_31 = arith.constant 0 : index
    %c0_32 = arith.constant 0 : index
    %41 = vector.load %arg12[%c0_31, %c0_32] : memref<1x512xf32, #tpu.memory_space<vmem>>, vector<1x512xf32>
    %42 = vector.broadcast %41 : vector<1x512xf32> to vector<8x512xf32>
    %43 = arith.addf %40, %42 : vector<8x512xf32>
    %cst_33 = arith.constant 0.000000e+00 : f32
    %44 = vector.broadcast %cst_33 : f32 to vector<8x512xf32>
    %45 = arith.maximumf %43, %44 : vector<8x512xf32>
    %46 = arith.truncf %45 : vector<8x512xf32> to vector<8x512xbf16>
    %c0_34 = arith.constant 0 : index
    %c0_35 = arith.constant 0 : index
    %47 = vector.load %arg13[%c0_34, %c0_35] : memref<512x784xbf16, #tpu.memory_space<vmem>>, vector<512x784xbf16>
    %cst_36 = arith.constant dense<0.000000e+00> : vector<8x784xf32>
    %48 = tpu.matmul %46, %47, %cst_36 {dimension_numbers = #tpu.dot_dimension_numbers<[1], [0], [0], [1], [0, 0, 1, 1], [], []>} : vector<8x512xbf16>, vector<512x784xbf16>, vector<8x784xf32> -> vector<8x784xf32>
    %c0_37 = arith.constant 0 : index
    %c0_38 = arith.constant 0 : index
    %49 = vector.load %arg14[%c0_37, %c0_38] : memref<1x784xf32, #tpu.memory_space<vmem>>, vector<1x784xf32>
    %50 = vector.broadcast %49 : vector<1x784xf32> to vector<8x784xf32>
    %51 = arith.addf %48, %50 : vector<8x784xf32>
    %52 = arith.negf %51 : vector<8x784xf32>
    %53 = math.exp %52 : vector<8x784xf32>
    %cst_39 = arith.constant 1.000000e+00 : f32
    %54 = vector.broadcast %cst_39 : f32 to vector<8x784xf32>
    %55 = arith.addf %54, %53 : vector<8x784xf32>
    %56 = arith.divf %54, %55 : vector<8x784xf32>
    %c0_40 = arith.constant 0 : index
    %c0_41 = arith.constant 0 : index
    %57 = vector.load %arg15[%c0_40, %c0_41] : memref<8x784xf32, #tpu.memory_space<vmem>>, vector<8x784xf32>
    tpu.vector_store %arg15[%c0_40, %c0_41], %56 {strides = array<i32>} : memref<8x784xf32, #tpu.memory_space<vmem>>, vector<8x784xf32>,
    return
  }
  func.func @transform_0(%arg0: i32) -> (i32, i32) {
    %c0_i32 = arith.constant 0 : i32
    %c0_i32_0 = arith.constant 0 : i32
    return %arg0, %c0_i32 : i32, i32
  }
  func.func @transform_1(%arg0: i32) -> (i32, i32) {
    %c0_i32 = arith.constant 0 : i32
    %c0_i32_0 = arith.constant 0 : i32
    return %arg0, %c0_i32 : i32, i32
  }
  func.func @transform_2(%arg0: i32) -> (i32, i32) {
    %c0_i32 = arith.constant 0 : i32
    %c0_i32_0 = arith.constant 0 : i32
    %c0_i32_1 = arith.constant 0 : i32
    return %c0_i32, %c0_i32_0 : i32, i32
  }
  func.func @transform_3(%arg0: i32) -> (i32, i32) {
    %c0_i32 = arith.constant 0 : i32
    %c0_i32_0 = arith.constant 0 : i32
    %c0_i32_1 = arith.constant 0 : i32
    return %c0_i32, %c0_i32_0 : i32, i32
  }
  func.func @transform_4(%arg0: i32) -> (i32, i32) {
    %c0_i32 = arith.constant 0 : i32
    %c0_i32_0 = arith.constant 0 : i32
    %c0_i32_1 = arith.constant 0 : i32
    return %c0_i32, %c0_i32_0 : i32, i32
  }
  func.func @transform_5(%arg0: i32) -> (i32, i32) {
    %c0_i32 = arith.constant 0 : i32
    %c0_i32_0 = arith.constant 0 : i32
    %c0_i32_1 = arith.constant 0 : i32
    return %c0_i32, %c0_i32_0 : i32, i32
  }
  func.func @transform_6(%arg0: i32) -> (i32, i32) {
    %c0_i32 = arith.constant 0 : i32
    %c0_i32_0 = arith.constant 0 : i32
    %c0_i32_1 = arith.constant 0 : i32
    return %c0_i32, %c0_i32_0 : i32, i32
  }
  func.func @transform_7(%arg0: i32) -> (i32, i32) {
    %c0_i32 = arith.constant 0 : i32
    %c0_i32_0 = arith.constant 0 : i32
    %c0_i32_1 = arith.constant 0 : i32
    return %c0_i32, %c0_i32_0 : i32, i32
  }
  func.func @transform_8(%arg0: i32) -> (i32, i32) {
    %c0_i32 = arith.constant 0 : i32
    %c0_i32_0 = arith.constant 0 : i32
    %c0_i32_1 = arith.constant 0 : i32
    return %c0_i32, %c0_i32_0 : i32, i32
  }
  func.func @transform_9(%arg0: i32) -> (i32, i32) {
    %c0_i32 = arith.constant 0 : i32
    %c0_i32_0 = arith.constant 0 : i32
    %c0_i32_1 = arith.constant 0 : i32
    return %c0_i32, %c0_i32_0 : i32, i32
  }
  func.func @transform_10(%arg0: i32) -> (i32, i32) {
    %c0_i32 = arith.constant 0 : i32
    %c0_i32_0 = arith.constant 0 : i32
    %c0_i32_1 = arith.constant 0 : i32
    return %c0_i32, %c0_i32_0 : i32, i32
  }
  func.func @transform_11(%arg0: i32) -> (i32, i32) {
    %c0_i32 = arith.constant 0 : i32
    %c0_i32_0 = arith.constant 0 : i32
    %c0_i32_1 = arith.constant 0 : i32
    return %c0_i32, %c0_i32_0 : i32, i32
  }
  func.func @transform_12(%arg0: i32) -> (i32, i32) {
    %c0_i32 = arith.constant 0 : i32
    %c0_i32_0 = arith.constant 0 : i32
    %c0_i32_1 = arith.constant 0 : i32
    return %c0_i32, %c0_i32_0 : i32, i32
  }
  func.func @transform_13(%arg0: i32) -> (i32, i32) {
    %c0_i32 = arith.constant 0 : i32
    %c0_i32_0 = arith.constant 0 : i32
    %c0_i32_1 = arith.constant 0 : i32
    return %c0_i32, %c0_i32_0 : i32, i32
  }
  func.func @transform_14(%arg0: i32) -> (i32, i32) {
    %c0_i32 = arith.constant 0 : i32
    %c0_i32_0 = arith.constant 0 : i32
    return %arg0, %c0_i32 : i32, i32
  }
  func.func @transform_15(%arg0: i32) -> (i32, i32) {
    %c0_i32 = arith.constant 0 : i32
    %c0_i32_0 = arith.constant 0 : i32
    return %arg0, %c0_i32 : i32, i32
  }
}

</mosaic_0001>

<bundles_post_ra>
// kernel: vae_forward.1
= control target key start
LH: loop header
LB: loop body
LE: loop exit
PB: predicated region body
PF: predicated region fallthrough
CT: control target
= control target key end

     0   :  { %vm1263_vm0 = vcmask 130048   ;;  %s7483_s0 = inlined_call_operand.vmem [shape: f32[8,784], index: 0, kind: input, shape index: {}]   ;;  %s7484_s1 = inlined_call_operand.vmem [shape: f32[8,2], index: 1, kind: input, shape index: {}]   ;;  %s7485_s2 = inlined_call_operand.vmem [shape: bf16[784,512], index: 2, kind: input, shape index: {}]   ;;  %s7486_s3 = inlined_call_operand.vmem [shape: f32[1,512], index: 3, kind: input, shape index: {}]   ;;  %s7487_s4 = inlined_call_operand.vmem [shape: bf16[512,128], index: 4, kind: input, shape index: {}]   ;;  %s7488_s5 = inlined_call_operand.vmem [shape: f32[1,128], index: 5, kind: input, shape index: {}]   ;;  %s7489_s6 = inlined_call_operand.vmem [shape: f32[128,4], index: 6, kind: input, shape index: {}]   ;;  %s7490_s7 = inlined_call_operand.vmem [shape: f32[1,4], index: 7, kind: input, shape index: {}]   ;;  %s7491_s8 = inlined_call_operand.vmem [shape: f32[2,128], index: 8, kind: input, shape index: {}]   ;;  %s7492_s9 = inlined_call_operand.vmem [shape: f32[1,128], index: 9, kind: input, shape index: {}]   ;;  %s7493_s10 = inlined_call_operand.vmem [shape: bf16[128,512], index: 10, kind: input, shape index: {}]   ;;  %s7494_s11 = inlined_call_operand.vmem [shape: f32[1,512], index: 11, kind: input, shape index: {}]   ;;  %s7495_s12 = inlined_call_operand.vmem [shape: bf16[512,784], index: 12, kind: input, shape index: {}]   ;;  %s7496_s13 = inlined_call_operand.vmem [shape: f32[1,784], index: 13, kind: input, shape index: {}]   ;;  %s7497_s14 = inlined_call_operand.hbm [shape: f32[8,784], index: 14, kind: output, shape index: {0}]   ;;  %s7498_s15 = inlined_call_operand.vmem [shape: f32[8,4], index: 15, kind: output, shape index: {1}]  }
   0x1   :  { %v5001_v0 = vld [vmem:[%s7485_s2 + $0x4] ss:$16 sps:$4 sm:$0xff]   ;;  %v5003_v1 = vld [vmem:[%s7485_s2 + $0xc] ss:$16 sps:$4 sm:$0xff]   ;;  %v5005_v2 = vld [vmem:[%s7485_s2] ss:$16 sps:$4 sm:$0xff]  }
   0x2   :  { %1267 = vmatprep.subr.bf16.mxu0 %v5001_v0  ;;  %v5006_v3 = vld [vmem:[%s7485_s2 + $0x8] ss:$16 sps:$4 sm:$0xff]   ;;  %1431 = vmatprep.subr.bf16.mxu1 %v5003_v1  ;;  %v5007_v4 = vld [vmem:[%s7485_s2 + $0x24] ss:$16 sps:$4 sm:$0xff]   ;;  %v5009_v5 = vld [vmem:[%s7485_s2 + $0x2c] ss:$16 sps:$4 sm:$0xff]  }
   0x3   :  { %1268 = vmatpush1.bf16.msra.mxu0 %v5005_v2  ;;  %1432 = vmatpush1.bf16.msra.mxu1 %v5006_v3  ;;  %v5011_v6 = vld [vmem:[%s7485_s2 + $0x20] ss:$16 sps:$4 sm:$0xff]   ;;  %v5012_v7 = vld [vmem:[%s7485_s2 + $0x28] ss:$16 sps:$4 sm:$0xff]   ;;  %v5013_v8 = vld [vmem:[%s7485_s2 + $0x44] ss:$16 sps:$4 sm:$0xff]  }
   0x4   :  { %1269 = vmatprep.subr.bf16.mxu0 %v5007_v4  ;;  %1433 = vmatprep.subr.bf16.mxu1 %v5009_v5  ;;  %v5015_v9 = vld [vmem:[%s7485_s2 + $0x4c] ss:$16 sps:$4 sm:$0xff]   ;;  %v5017_v10 = vld [vmem:[%s7485_s2 + $0x40] ss:$16 sps:$4 sm:$0xff]   ;;  %v5018_v11 = vld [vmem:[%s7485_s2 + $0x48] ss:$16 sps:$4 sm:$0xff]  }
   0x5   :  { %v5019_v12 = vld [vmem:[%s7485_s2 + $0x64] ss:$16 sps:$4 sm:$0xff]   ;;  %v5021_v13 = vld [vmem:[%s7485_s2 + $0x6c] ss:$16 sps:$4 sm:$0xff]   ;;  %v5023_v14 = vld [vmem:[%s7485_s2 + $0x60] ss:$16 sps:$4 sm:$0xff]  }
   0x6   :  { %v5024_v15 = vld [vmem:[%s7485_s2 + $0x68] ss:$16 sps:$4 sm:$0xff]   ;;  %v5025_v16 = vld [vmem:[%s7485_s2 + $0x84] ss:$16 sps:$4 sm:$0xff]   ;;  %v5027_v17 = vld [vmem:[%s7485_s2 + $0x8c] ss:$16 sps:$4 sm:$0xff]  }
   0x7   :  { %1270 = vmatpush1.bf16.msra.mxu0 %v5011_v6  ;;  %1434 = vmatpush1.bf16.msra.mxu1 %v5012_v7  ;;  %v5029_v18 = vld [vmem:[%s7485_s2 + $0x80] ss:$16 sps:$4 sm:$0xff]   ;;  %v5030_v19 = vld [vmem:[%s7485_s2 + $0x88] ss:$16 sps:$4 sm:$0xff]   ;;  %v5031_v20 = vld [vmem:[%s7485_s2 + $0xa4] ss:$16 sps:$4 sm:$0xff]  }
   0x8   :  { %1271 = vmatprep.subr.bf16.mxu0 %v5013_v8  ;;  %1435 = vmatprep.subr.bf16.mxu1 %v5015_v9  ;;  %v5033_v21 = vld [vmem:[%s7485_s2 + $0xac] ss:$16 sps:$4 sm:$0xff]   ;;  %v5035_v22 = vld [vmem:[%s7485_s2 + $0xa0] ss:$16 sps:$4 sm:$0xff]   ;;  %v5036_v23 = vld [vmem:[%s7485_s2 + $0xa8] ss:$16 sps:$4 sm:$0xff]  }
   0x9   :  { %v5037_v24 = vld [vmem:[%s7485_s2 + $0xc4] ss:$16 sps:$4 sm:$0xff]   ;;  %v5039_v25 = vld [vmem:[%s7485_s2 + $0xcc] ss:$16 sps:$4 sm:$0xff]   ;;  %v5041_v26 = vld [vmem:[%s7485_s2 + $0xc0] ss:$16 sps:$4 sm:$0xff]  }
   0xa   :  { %v5042_v27 = vld [vmem:[%s7485_s2 + $0xc8] ss:$16 sps:$4 sm:$0xff]   ;;  %v5043_v28 = vld [vmem:[%s7485_s2 + $0xe4] ss:$16 sps:$4 sm:$0xff]   ;;  %v5045_v29 = vld [vmem:[%s7485_s2 + $0xec] ss:$16 sps:$4 sm:$0xff]  }
   0xb   :  { %1272 = vmatpush1.bf16.msra.mxu0 %v5017_v10  ;;  %1436 = vmatpush1.bf16.msra.mxu1 %v5018_v11  ;;  %v5047_v30 = vld [vmem:[%s7485_s2 + $0xe0] ss:$16 sps:$4 sm:$0xff]   ;;  %v5048_v31 = vld [vmem:[%s7485_s2 + $0xe8] ss:$16 sps:$4 sm:$0xff]   ;;  %v5049_v32 = vld [vmem:[%s7485_s2 + $0x104] ss:$16 sps:$4 sm:$0xff]  }
   0xc   :  { %1273 = vmatprep.subr.bf16.mxu0 %v5019_v12  ;;  %1437 = vmatprep.subr.bf16.mxu1 %v5021_v13  ;;  %v5051_v33 = vld [vmem:[%s7485_s2 + $0x10c] ss:$16 sps:$4 sm:$0xff]   ;;  %v5053_v34 = vld [vmem:[%s7485_s2 + $0x100] ss:$16 sps:$4 sm:$0xff]   ;;  %v5054_v35 = vld [vmem:[%s7485_s2 + $0x108] ss:$16 sps:$4 sm:$0xff]  }
   0xd   :  { %v5055_v36 = vld [vmem:[%s7485_s2 + $0x124] ss:$16 sps:$4 sm:$0xff]   ;;  %v5057_v37 = vld [vmem:[%s7485_s2 + $0x12c] ss:$16 sps:$4 sm:$0xff]   ;;  %v5059_v38 = vld [vmem:[%s7485_s2 + $0x120] ss:$16 sps:$4 sm:$0xff]  }
   0xe   :  { %v5060_v39 = vld [vmem:[%s7485_s2 + $0x128] ss:$16 sps:$4 sm:$0xff]   ;;  %v5061_v40 = vld [vmem:[%s7485_s2 + $0x144] ss:$16 sps:$4 sm:$0xff]   ;;  %v5063_v41 = vld [vmem:[%s7485_s2 + $0x14c] ss:$16 sps:$4 sm:$0xff]  }
   0xf   :  { %1274 = vmatpush1.bf16.msra.mxu0 %v5023_v14  ;;  %1438 = vmatpush1.bf16.msra.mxu1 %v5024_v15  ;;  %v5065_v42 = vld [vmem:[%s7485_s2 + $0x140] ss:$16 sps:$4 sm:$0xff]   ;;  %v5066_v43 = vld [vmem:[%s7485_s2 + $0x148] ss:$16 sps:$4 sm:$0xff]   ;;  %v5067_v44 = vld [vmem:[%s7485_s2 + $0x164] ss:$16 sps:$4 sm:$0xff]  }
  0x10   :  { %1275 = vmatprep.subr.bf16.mxu0 %v5025_v16  ;;  %1439 = vmatprep.subr.bf16.mxu1 %v5027_v17  ;;  %v5069_v45 = vld [vmem:[%s7485_s2 + $0x16c] ss:$16 sps:$4 sm:$0xff]   ;;  %v5071_v47 = vld [vmem:[%s7485_s2 + $0x160] ss:$16 sps:$4 sm:$0xff]   ;;  %v5072_v49 = vld [vmem:[%s7485_s2 + $0x168] ss:$16 sps:$4 sm:$0xff]  }
  0x11   :  { %v52_v46 = vld [vmem:[%s7483_s0 + $0x8] sm:$0xff]  ;;  %v5073_v50 = vld [vmem:[%s7485_s2 + $0x184] ss:$16 sps:$4 sm:$0xff]   ;;  %v5077_v52 = vld [vmem:[%s7485_s2 + $0x180] ss:$16 sps:$4 sm:$0xff]  }
  0x12   :  { %v59_v48 = vpack.c.bf16 %v52_v46, %v52_v46  ;;  %v5075_v51 = vld [vmem:[%s7485_s2 + $0x18c] ss:$16 sps:$4 sm:$0xff]   ;;  %v5078_v53 = vld [vmem:[%s7485_s2 + $0x188] ss:$16 sps:$4 sm:$0xff]   ;;  %v5079_v54 = vld [vmem:[%s7485_s2 + $0x1a4] ss:$16 sps:$4 sm:$0xff]  }
  0x13   :  { %1276 = vmatpush1.bf16.msra.mxu0 %v5029_v18  ;;  %1440 = vmatpush1.bf16.msra.mxu1 %v5030_v19  ;;  %v5081_v55 = vld [vmem:[%s7485_s2 + $0x1ac] ss:$16 sps:$4 sm:$0xff]   ;;  %v5083_v56 = vld [vmem:[%s7485_s2 + $0x1a0] ss:$16 sps:$4 sm:$0xff]   ;;  %v5084_v57 = vld [vmem:[%s7485_s2 + $0x1a8] ss:$16 sps:$4 sm:$0xff]  }
  0x14   :  { %1277 = vmatprep.subr.bf16.mxu0 %v5031_v20  ;;  %1441 = vmatprep.subr.bf16.mxu1 %v5033_v21  ;;  %v5085_v58 = vld [vmem:[%s7485_s2 + $0x1c4] ss:$16 sps:$4 sm:$0xff]   ;;  %v5087_v59 = vld [vmem:[%s7485_s2 + $0x1cc] ss:$16 sps:$4 sm:$0xff]   ;;  %v5089_v60 = vld [vmem:[%s7485_s2 + $0x1c0] ss:$16 sps:$4 sm:$0xff]  }
  0x15   :  { %1299 = vmatprep.mubr.bf16.mxu0 %v59_v48  ;;  %1463 = vmatprep.mubr.bf16.mxu1 %v59_v48  ;;  %v5090_v61 = vld [vmem:[%s7485_s2 + $0x1c8] ss:$16 sps:$4 sm:$0xff]   ;;  %v5091_v62 = vld [vmem:[%s7485_s2 + $0x1e4] ss:$16 sps:$4 sm:$0xff]   ;;  %v5093_v63 = vld [vmem:[%s7485_s2 + $0x1ec] ss:$16 sps:$4 sm:$0xff]  }
  0x16   :  { %v5095_v0 = vld [vmem:[%s7485_s2 + $0x1e0] ss:$16 sps:$4 sm:$0xff]   ;;  %v5096_v1 = vld [vmem:[%s7485_s2 + $0x1e8] ss:$16 sps:$4 sm:$0xff]   ;;  %v5099_v3 = vld [vmem:[%s7485_s2 + $0x204] ss:$16 sps:$4 sm:$0xff]  }
  0x17   :  { %1278 = vmatpush1.bf16.msra.mxu0 %v5035_v22  ;;  %1442 = vmatpush1.bf16.msra.mxu1 %v5036_v23  ;;  %v51_v2 = vld [vmem:[%s7483_s0] sm:$0xff]  ;;  %v5102_v4 = vld [vmem:[%s7485_s2 + $0x20c] ss:$16 sps:$4 sm:$0xff]   ;;  %v5100_v7 = vld [vmem:[%s7485_s2 + $0x208] ss:$16 sps:$4 sm:$0xff]  }
  0x18   :  { %1279 = vmatprep.subr.bf16.mxu0 %v5037_v24  ;;  %1443 = vmatprep.subr.bf16.mxu1 %v5039_v25  ;;  %v58_v5 = vpack.c.bf16 %v51_v2, %v51_v2  ;;  %v5097_v6 = vld [vmem:[%s7485_s2 + $0x200] ss:$16 sps:$4 sm:$0xff]   ;;  %v5105_v8 = vld [vmem:[%s7485_s2 + $0x224] ss:$16 sps:$4 sm:$0xff]   ;;  %v5108_v9 = vld [vmem:[%s7485_s2 + $0x22c] ss:$16 sps:$4 sm:$0xff]  }
  0x19   :  { %v5103_v10 = vld [vmem:[%s7485_s2 + $0x220] ss:$16 sps:$4 sm:$0xff]   ;;  %v5106_v11 = vld [vmem:[%s7485_s2 + $0x228] ss:$16 sps:$4 sm:$0xff]   ;;  %v5111_v12 = vld [vmem:[%s7485_s2 + $0x244] ss:$16 sps:$4 sm:$0xff]  }
  0x1a   :  { %v5114_v13 = vld [vmem:[%s7485_s2 + $0x24c] ss:$16 sps:$4 sm:$0xff]   ;;  %v5109_v14 = vld [vmem:[%s7485_s2 + $0x240] ss:$16 sps:$4 sm:$0xff]   ;;  %v5112_v15 = vld [vmem:[%s7485_s2 + $0x248] ss:$16 sps:$4 sm:$0xff]  }
  0x1b   :  { %1280 = vmatpush1.bf16.msra.mxu0 %v5041_v26  ;;  %1444 = vmatpush1.bf16.msra.mxu1 %v5042_v27  ;;  %v5117_v16 = vld [vmem:[%s7485_s2 + $0x264] ss:$16 sps:$4 sm:$0xff]   ;;  %v5120_v17 = vld [vmem:[%s7485_s2 + $0x26c] ss:$16 sps:$4 sm:$0xff]   ;;  %v5115_v18 = vld [vmem:[%s7485_s2 + $0x260] ss:$16 sps:$4 sm:$0xff]  }
  0x1c   :  { %1281 = vmatprep.subr.bf16.mxu0 %v5043_v28  ;;  %1445 = vmatprep.subr.bf16.mxu1 %v5045_v29  ;;  %v5118_v19 = vld [vmem:[%s7485_s2 + $0x268] ss:$16 sps:$4 sm:$0xff]   ;;  %v5123_v20 = vld [vmem:[%s7485_s2 + $0x284] ss:$16 sps:$4 sm:$0xff]   ;;  %v5126_v21 = vld [vmem:[%s7485_s2 + $0x28c] ss:$16 sps:$4 sm:$0xff]  }
  0x1d   :  { %v5121_v22 = vld [vmem:[%s7485_s2 + $0x280] ss:$16 sps:$4 sm:$0xff]   ;;  %v5124_v23 = vld [vmem:[%s7485_s2 + $0x288] ss:$16 sps:$4 sm:$0xff]   ;;  %v5129_v24 = vld [vmem:[%s7485_s2 + $0x2a4] ss:$16 sps:$4 sm:$0xff]  }
  0x1e   :  { %v5132_v25 = vld [vmem:[%s7485_s2 + $0x2ac] ss:$16 sps:$4 sm:$0xff]   ;;  %v5127_v26 = vld [vmem:[%s7485_s2 + $0x2a0] ss:$16 sps:$4 sm:$0xff]   ;;  %v5130_v27 = vld [vmem:[%s7485_s2 + $0x2a8] ss:$16 sps:$4 sm:$0xff]  }
  0x1f   :  { %1282 = vmatpush1.bf16.msra.mxu0 %v5047_v30  ;;  %1446 = vmatpush1.bf16.msra.mxu1 %v5048_v31  ;;  %v5135_v28 = vld [vmem:[%s7485_s2 + $0x2c4] ss:$16 sps:$4 sm:$0xff]   ;;  %v5138_v29 = vld [vmem:[%s7485_s2 + $0x2cc] ss:$16 sps:$4 sm:$0xff]   ;;  %v5133_v31 = vld [vmem:[%s7485_s2 + $0x2c0] ss:$16 sps:$4 sm:$0xff]  }
  0x20   :  { %1283 = vmatprep.subr.bf16.mxu0 %v5049_v32  ;;  %1447 = vmatprep.subr.bf16.mxu1 %v5051_v33  ;;  %v54_v30 = vld [vmem:[%s7483_s0 + $0x18] sm:$0xff]  ;;  %v5159_v46 = vld [vmem:[%s7485_s2 + $0x344] ss:$16 sps:$4 sm:$0xff]   ;;  %v5157_v48 = vld [vmem:[%s7485_s2 + $0x340] ss:$16 sps:$4 sm:$0xff]  }
  0x21   :  { %v61_v32 = vpack.c.bf16 %v54_v30, %v54_v30  ;;  %v5136_v33 = vld [vmem:[%s7485_s2 + $0x2c8] ss:$16 sps:$4 sm:$0xff]   ;;  %v5189_v2 = vld [vmem:[%s7485_s2 + $0x3e4] ss:$16 sps:$4 sm:$0xff]  }
  0x22   :  { %v5225_v30 = vld [vmem:[%s7485_s2 + $0x4a4] ss:$16 sps:$4 sm:$0xff]  }
  0x23   :  { %1284 = vmatpush1.bf16.msra.mxu0 %v5053_v34  ;;  %1448 = vmatpush1.bf16.msra.mxu1 %v5054_v35  ;;  %v5141_v34 = vld [vmem:[%s7485_s2 + $0x2e4] ss:$16 sps:$4 sm:$0xff]   ;;  %v5144_v35 = vld [vmem:[%s7485_s2 + $0x2ec] ss:$16 sps:$4 sm:$0xff]  }
  0x24   :  { %1285 = vmatprep.subr.bf16.mxu0 %v5055_v36  ;;  %1449 = vmatprep.subr.bf16.mxu1 %v5057_v37  ;;  %v5139_v36 = vld [vmem:[%s7485_s2 + $0x2e0] ss:$16 sps:$4 sm:$0xff]   ;;  %v5142_v37 = vld [vmem:[%s7485_s2 + $0x2e8] ss:$16 sps:$4 sm:$0xff]  }
  0x27   :  { %1286 = vmatpush1.bf16.msra.mxu0 %v5059_v38  ;;  %1450 = vmatpush1.bf16.msra.mxu1 %v5060_v39  ;;  %v5147_v38 = vld [vmem:[%s7485_s2 + $0x304] ss:$16 sps:$4 sm:$0xff]   ;;  %v5150_v39 = vld [vmem:[%s7485_s2 + $0x30c] ss:$16 sps:$4 sm:$0xff]  }
  0x28   :  { %1287 = vmatprep.subr.bf16.mxu0 %v5061_v40  ;;  %1451 = vmatprep.subr.bf16.mxu1 %v5063_v41  ;;  %v5145_v40 = vld [vmem:[%s7485_s2 + $0x300] ss:$16 sps:$4 sm:$0xff]   ;;  %v5148_v41 = vld [vmem:[%s7485_s2 + $0x308] ss:$16 sps:$4 sm:$0xff]  }
  0x2b   :  { %1288 = vmatpush1.bf16.msra.mxu0 %v5065_v42  ;;  %1452 = vmatpush1.bf16.msra.mxu1 %v5066_v43  ;;  %v5153_v42 = vld [vmem:[%s7485_s2 + $0x324] ss:$16 sps:$4 sm:$0xff]   ;;  %v5156_v43 = vld [vmem:[%s7485_s2 + $0x32c] ss:$16 sps:$4 sm:$0xff]  }
  0x2c   :  { %1289 = vmatprep.subr.bf16.mxu0 %v5067_v44  ;;  %1453 = vmatprep.subr.bf16.mxu1 %v5069_v45  ;;  %v5151_v44 = vld [vmem:[%s7485_s2 + $0x320] ss:$16 sps:$4 sm:$0xff]   ;;  %v5154_v45 = vld [vmem:[%s7485_s2 + $0x328] ss:$16 sps:$4 sm:$0xff]  }
  0x2f   :  { %1290 = vmatpush1.bf16.msra.mxu0 %v5071_v47  ;;  %1454 = vmatpush1.bf16.msra.mxu1 %v5072_v49  ;;  %v5162_v47 = vld [vmem:[%s7485_s2 + $0x34c] ss:$16 sps:$4 sm:$0xff]   ;;  %v5160_v49 = vld [vmem:[%s7485_s2 + $0x348] ss:$16 sps:$4 sm:$0xff]  }
  0x30   :  { %1291 = vmatprep.subr.bf16.mxu0 %v5073_v50  ;;  %1455 = vmatprep.subr.bf16.mxu1 %v5075_v51  ;;  %v5165_v50 = vld [vmem:[%s7485_s2 + $0x364] ss:$16 sps:$4 sm:$0xff]   ;;  %v5168_v51 = vld [vmem:[%s7485_s2 + $0x36c] ss:$16 sps:$4 sm:$0xff]  }
  0x33   :  { %1292 = vmatpush1.bf16.msra.mxu0 %v5077_v52  ;;  %1456 = vmatpush1.bf16.msra.mxu1 %v5078_v53  ;;  %v5163_v52 = vld [vmem:[%s7485_s2 + $0x360] ss:$16 sps:$4 sm:$0xff]   ;;  %v5166_v53 = vld [vmem:[%s7485_s2 + $0x368] ss:$16 sps:$4 sm:$0xff]  }
  0x34   :  { %1293 = vmatprep.subr.bf16.mxu0 %v5079_v54  ;;  %1457 = vmatprep.subr.bf16.mxu1 %v5081_v55  ;;  %v5171_v54 = vld [vmem:[%s7485_s2 + $0x384] ss:$16 sps:$4 sm:$0xff]   ;;  %v5174_v55 = vld [vmem:[%s7485_s2 + $0x38c] ss:$16 sps:$4 sm:$0xff]  }
  0x37   :  { %1294 = vmatpush1.bf16.msra.mxu0 %v5083_v56  ;;  %1458 = vmatpush1.bf16.msra.mxu1 %v5084_v57  ;;  %v5169_v56 = vld [vmem:[%s7485_s2 + $0x380] ss:$16 sps:$4 sm:$0xff]   ;;  %v5172_v57 = vld [vmem:[%s7485_s2 + $0x388] ss:$16 sps:$4 sm:$0xff]  }
  0x38   :  { %1295 = vmatprep.subr.bf16.mxu0 %v5085_v58  ;;  %1459 = vmatprep.subr.bf16.mxu1 %v5087_v59  ;;  %v5177_v58 = vld [vmem:[%s7485_s2 + $0x3a4] ss:$16 sps:$4 sm:$0xff]   ;;  %v5180_v59 = vld [vmem:[%s7485_s2 + $0x3ac] ss:$16 sps:$4 sm:$0xff]  }
  0x3b   :  { %1296 = vmatpush1.bf16.msra.mxu0 %v5089_v60  ;;  %1460 = vmatpush1.bf16.msra.mxu1 %v5090_v61  ;;  %v5175_v60 = vld [vmem:[%s7485_s2 + $0x3a0] ss:$16 sps:$4 sm:$0xff]   ;;  %v5178_v61 = vld [vmem:[%s7485_s2 + $0x3a8] ss:$16 sps:$4 sm:$0xff]  }
  0x3c   :  { %1297 = vmatprep.subr.bf16.mxu0 %v5091_v62  ;;  %1461 = vmatprep.subr.bf16.mxu1 %v5093_v63  ;;  %v5183_v62 = vld [vmem:[%s7485_s2 + $0x3c4] ss:$16 sps:$4 sm:$0xff]   ;;  %v5186_v63 = vld [vmem:[%s7485_s2 + $0x3cc] ss:$16 sps:$4 sm:$0xff]  }
  0x3f   :  { %1298 = vmatpush1.bf16.msra.mxu0 %v5095_v0  ;;  %1462 = vmatpush1.bf16.msra.mxu1 %v5096_v1  ;;  %v5181_v0 = vld [vmem:[%s7485_s2 + $0x3c0] ss:$16 sps:$4 sm:$0xff]   ;;  %v5184_v1 = vld [vmem:[%s7485_s2 + $0x3c8] ss:$16 sps:$4 sm:$0xff]  }
  0x40   :  { %1308 = vmatprep.subr.bf16.mxu0 %v5099_v3  ;;  %1472 = vmatprep.subr.bf16.mxu1 %v5102_v4  ;;  %v5192_v3 = vld [vmem:[%s7485_s2 + $0x3ec] ss:$16 sps:$4 sm:$0xff]   ;;  %v5187_v4 = vld [vmem:[%s7485_s2 + $0x3e0] ss:$16 sps:$4 sm:$0xff]  }
  0x42   :  { %1300 = vmatmul.mubr.bf16.vlgmr.msra.gmra.mrb[0].mxu0 %v58_v5  ;;  %1464 = vmatmul.mubr.bf16.vlgmr.msra.gmra.mrb[0].mxu1 %v58_v5  ;;  %v5190_v5 = vld [vmem:[%s7485_s2 + $0x3e8] ss:$16 sps:$4 sm:$0xff]  }
  0x43   :  { %1309 = vmatpush1.bf16.msra.mxu0 %v5097_v6  ;;  %1473 = vmatpush1.bf16.msra.mxu1 %v5100_v7  ;;  %v5195_v6 = vld [vmem:[%s7485_s2 + $0x404] ss:$16 sps:$4 sm:$0xff]  }
  0x44   :  { %1310 = vmatprep.subr.bf16.mxu0 %v5105_v8  ;;  %1474 = vmatprep.subr.bf16.mxu1 %v5108_v9  ;;  %v53_v7 = vld [vmem:[%s7483_s0 + $0x10] sm:$0xff]  ;;  %v5198_v8 = vld [vmem:[%s7485_s2 + $0x40c] ss:$16 sps:$4 sm:$0xff]  }
  0x45   :  { %1340 = vmatprep.mubr.bf16.mxu0 %v61_v32  ;;  %1504 = vmatprep.mubr.bf16.mxu1 %v61_v32  ;;  %v5193_v9 = vld [vmem:[%s7485_s2 + $0x400] ss:$16 sps:$4 sm:$0xff]  }
  0x46   :  { %v5223_v32 = vld [vmem:[%s7485_s2 + $0x4a0] ss:$16 sps:$4 sm:$0xff]  }
  0x47   :  { %1311 = vmatpush1.bf16.msra.mxu0 %v5103_v10  ;;  %1475 = vmatpush1.bf16.msra.mxu1 %v5106_v11  ;;  %v60_v10 = vpack.c.bf16 %v53_v7, %v53_v7  ;;  %v5196_v11 = vld [vmem:[%s7485_s2 + $0x408] ss:$16 sps:$4 sm:$0xff]   ;;  %v5288_v7 = vld [vmem:[%s7485_s2 + $0x5ec] ss:$16 sps:$4 sm:$0xff]  }
  0x48   :  { %1312 = vmatprep.subr.bf16.mxu0 %v5111_v12  ;;  %1476 = vmatprep.subr.bf16.mxu1 %v5114_v13  ;;  %v5201_v12 = vld [vmem:[%s7485_s2 + $0x424] ss:$16 sps:$4 sm:$0xff]   ;;  %v5204_v13 = vld [vmem:[%s7485_s2 + $0x42c] ss:$16 sps:$4 sm:$0xff]  }
  0x4b   :  { %1313 = vmatpush1.bf16.msra.mxu0 %v5109_v14  ;;  %1477 = vmatpush1.bf16.msra.mxu1 %v5112_v15  ;;  %v56_v14 = vld [vmem:[%s7483_s0 + $0x28] sm:$0xff] }
  0x4c   :  { %1314 = vmatprep.subr.bf16.mxu0 %v5117_v16  ;;  %1478 = vmatprep.subr.bf16.mxu1 %v5120_v17  ;;  %v63_v15 = vpack.c.bf16 %v56_v14, %v56_v14  ;;  %v5199_v16 = vld [vmem:[%s7485_s2 + $0x420] ss:$16 sps:$4 sm:$0xff]   ;;  %v5202_v17 = vld [vmem:[%s7485_s2 + $0x428] ss:$16 sps:$4 sm:$0xff]  }
  0x4f   :  { %1315 = vmatpush1.bf16.msra.mxu0 %v5115_v18  ;;  %1479 = vmatpush1.bf16.msra.mxu1 %v5118_v19  ;;  %v5207_v18 = vld [vmem:[%s7485_s2 + $0x444] ss:$16 sps:$4 sm:$0xff]   ;;  %v5210_v19 = vld [vmem:[%s7485_s2 + $0x44c] ss:$16 sps:$4 sm:$0xff]  }
  0x50   :  { %1316 = vmatprep.subr.bf16.mxu0 %v5123_v20  ;;  %1480 = vmatprep.subr.bf16.mxu1 %v5126_v21  ;;  %v5205_v20 = vld [vmem:[%s7485_s2 + $0x440] ss:$16 sps:$4 sm:$0xff]   ;;  %v5208_v21 = vld [vmem:[%s7485_s2 + $0x448] ss:$16 sps:$4 sm:$0xff]  }
  0x53   :  { %1317 = vmatpush1.bf16.msra.mxu0 %v5121_v22  ;;  %1481 = vmatpush1.bf16.msra.mxu1 %v5124_v23  ;;  %v5213_v22 = vld [vmem:[%s7485_s2 + $0x464] ss:$16 sps:$4 sm:$0xff]   ;;  %v5216_v23 = vld [vmem:[%s7485_s2 + $0x46c] ss:$16 sps:$4 sm:$0xff]  }
  0x54   :  { %1318 = vmatprep.subr.bf16.mxu0 %v5129_v24  ;;  %1482 = vmatprep.subr.bf16.mxu1 %v5132_v25  ;;  %v5211_v24 = vld [vmem:[%s7485_s2 + $0x460] ss:$16 sps:$4 sm:$0xff]   ;;  %v5214_v25 = vld [vmem:[%s7485_s2 + $0x468] ss:$16 sps:$4 sm:$0xff]  }
  0x57   :  { %1319 = vmatpush1.bf16.msra.mxu0 %v5127_v26  ;;  %1483 = vmatpush1.bf16.msra.mxu1 %v5130_v27  ;;  %v5219_v26 = vld [vmem:[%s7485_s2 + $0x484] ss:$16 sps:$4 sm:$0xff]   ;;  %v5222_v27 = vld [vmem:[%s7485_s2 + $0x48c] ss:$16 sps:$4 sm:$0xff]  }
  0x58   :  { %1320 = vmatprep.subr.bf16.mxu0 %v5135_v28  ;;  %1484 = vmatprep.subr.bf16.mxu1 %v5138_v29  ;;  %v5217_v28 = vld [vmem:[%s7485_s2 + $0x480] ss:$16 sps:$4 sm:$0xff]   ;;  %v5220_v29 = vld [vmem:[%s7485_s2 + $0x488] ss:$16 sps:$4 sm:$0xff]  }
  0x5b   :  { %1321 = vmatpush1.bf16.msra.mxu0 %v5133_v31  ;;  %1485 = vmatpush1.bf16.msra.mxu1 %v5136_v33  ;;  %v5228_v31 = vld [vmem:[%s7485_s2 + $0x4ac] ss:$16 sps:$4 sm:$0xff]   ;;  %v5226_v33 = vld [vmem:[%s7485_s2 + $0x4a8] ss:$16 sps:$4 sm:$0xff]  }
  0x5c   :  { %1322 = vmatprep.subr.bf16.mxu0 %v5141_v34  ;;  %1486 = vmatprep.subr.bf16.mxu1 %v5144_v35  ;;  %v5231_v34 = vld [vmem:[%s7485_s2 + $0x4c4] ss:$16 sps:$4 sm:$0xff]   ;;  %v5234_v35 = vld [vmem:[%s7485_s2 + $0x4cc] ss:$16 sps:$4 sm:$0xff]  }
  0x5f   :  { %1323 = vmatpush1.bf16.msra.mxu0 %v5139_v36  ;;  %1487 = vmatpush1.bf16.msra.mxu1 %v5142_v37  ;;  %v5229_v36 = vld [vmem:[%s7485_s2 + $0x4c0] ss:$16 sps:$4 sm:$0xff]   ;;  %v5232_v37 = vld [vmem:[%s7485_s2 + $0x4c8] ss:$16 sps:$4 sm:$0xff]  }
  0x60   :  { %1324 = vmatprep.subr.bf16.mxu0 %v5147_v38  ;;  %1488 = vmatprep.subr.bf16.mxu1 %v5150_v39  ;;  %v5237_v38 = vld [vmem:[%s7485_s2 + $0x4e4] ss:$16 sps:$4 sm:$0xff]   ;;  %v5240_v39 = vld [vmem:[%s7485_s2 + $0x4ec] ss:$16 sps:$4 sm:$0xff]  }
  0x63   :  { %1325 = vmatpush1.bf16.msra.mxu0 %v5145_v40  ;;  %1489 = vmatpush1.bf16.msra.mxu1 %v5148_v41  ;;  %v5235_v40 = vld [vmem:[%s7485_s2 + $0x4e0] ss:$16 sps:$4 sm:$0xff]   ;;  %v5238_v41 = vld [vmem:[%s7485_s2 + $0x4e8] ss:$16 sps:$4 sm:$0xff]  }
  0x64   :  { %1326 = vmatprep.subr.bf16.mxu0 %v5153_v42  ;;  %1490 = vmatprep.subr.bf16.mxu1 %v5156_v43  ;;  %v5243_v42 = vld [vmem:[%s7485_s2 + $0x504] ss:$16 sps:$4 sm:$0xff]   ;;  %v5246_v43 = vld [vmem:[%s7485_s2 + $0x50c] ss:$16 sps:$4 sm:$0xff]  }
  0x67   :  { %1327 = vmatpush1.bf16.msra.mxu0 %v5151_v44  ;;  %1491 = vmatpush1.bf16.msra.mxu1 %v5154_v45  ;;  %v5241_v44 = vld [vmem:[%s7485_s2 + $0x500] ss:$16 sps:$4 sm:$0xff]   ;;  %v5244_v45 = vld [vmem:[%s7485_s2 + $0x508] ss:$16 sps:$4 sm:$0xff]  }
  0x68   :  { %1328 = vmatprep.subr.bf16.mxu0 %v5159_v46  ;;  %1492 = vmatprep.subr.bf16.mxu1 %v5162_v47  ;;  %v5249_v46 = vld [vmem:[%s7485_s2 + $0x524] ss:$16 sps:$4 sm:$0xff]   ;;  %v5252_v47 = vld [vmem:[%s7485_s2 + $0x52c] ss:$16 sps:$4 sm:$0xff]  }
  0x6b   :  { %1329 = vmatpush1.bf16.msra.mxu0 %v5157_v48  ;;  %1493 = vmatpush1.bf16.msra.mxu1 %v5160_v49  ;;  %v5247_v48 = vld [vmem:[%s7485_s2 + $0x520] ss:$16 sps:$4 sm:$0xff]   ;;  %v5250_v49 = vld [vmem:[%s7485_s2 + $0x528] ss:$16 sps:$4 sm:$0xff]  }
  0x6c   :  { %1330 = vmatprep.subr.bf16.mxu0 %v5165_v50  ;;  %1494 = vmatprep.subr.bf16.mxu1 %v5168_v51  ;;  %v5255_v50 = vld [vmem:[%s7485_s2 + $0x544] ss:$16 sps:$4 sm:$0xff]   ;;  %v5258_v51 = vld [vmem:[%s7485_s2 + $0x54c] ss:$16 sps:$4 sm:$0xff]  }
  0x6f   :  { %1331 = vmatpush1.bf16.msra.mxu0 %v5163_v52  ;;  %1495 = vmatpush1.bf16.msra.mxu1 %v5166_v53  ;;  %v5253_v52 = vld [vmem:[%s7485_s2 + $0x540] ss:$16 sps:$4 sm:$0xff]   ;;  %v5256_v53 = vld [vmem:[%s7485_s2 + $0x548] ss:$16 sps:$4 sm:$0xff]  }
  0x70   :  { %1332 = vmatprep.subr.bf16.mxu0 %v5171_v54  ;;  %1496 = vmatprep.subr.bf16.mxu1 %v5174_v55  ;;  %v5261_v54 = vld [vmem:[%s7485_s2 + $0x564] ss:$16 sps:$4 sm:$0xff]   ;;  %v5264_v55 = vld [vmem:[%s7485_s2 + $0x56c] ss:$16 sps:$4 sm:$0xff]  }
  0x73   :  { %1333 = vmatpush1.bf16.msra.mxu0 %v5169_v56  ;;  %1497 = vmatpush1.bf16.msra.mxu1 %v5172_v57  ;;  %v5259_v56 = vld [vmem:[%s7485_s2 + $0x560] ss:$16 sps:$4 sm:$0xff]   ;;  %v5262_v57 = vld [vmem:[%s7485_s2 + $0x568] ss:$16 sps:$4 sm:$0xff]  }
  0x74   :  { %1334 = vmatprep.subr.bf16.mxu0 %v5177_v58  ;;  %1498 = vmatprep.subr.bf16.mxu1 %v5180_v59  ;;  %v5267_v58 = vld [vmem:[%s7485_s2 + $0x584] ss:$16 sps:$4 sm:$0xff]   ;;  %v5270_v59 = vld [vmem:[%s7485_s2 + $0x58c] ss:$16 sps:$4 sm:$0xff]  }
  0x77   :  { %1335 = vmatpush1.bf16.msra.mxu0 %v5175_v60  ;;  %1499 = vmatpush1.bf16.msra.mxu1 %v5178_v61  ;;  %v5265_v60 = vld [vmem:[%s7485_s2 + $0x580] ss:$16 sps:$4 sm:$0xff]   ;;  %v5268_v61 = vld [vmem:[%s7485_s2 + $0x588] ss:$16 sps:$4 sm:$0xff]  }
  0x78   :  { %1336 = vmatprep.subr.bf16.mxu0 %v5183_v62  ;;  %1500 = vmatprep.subr.bf16.mxu1 %v5186_v63  ;;  %v5273_v62 = vld [vmem:[%s7485_s2 + $0x5a4] ss:$16 sps:$4 sm:$0xff]   ;;  %v5276_v63 = vld [vmem:[%s7485_s2 + $0x5ac] ss:$16 sps:$4 sm:$0xff]  }
  0x7b   :  { %1337 = vmatpush1.bf16.msra.mxu0 %v5181_v0  ;;  %1501 = vmatpush1.bf16.msra.mxu1 %v5184_v1  ;;  %v5271_v0 = vld [vmem:[%s7485_s2 + $0x5a0] ss:$16 sps:$4 sm:$0xff]   ;;  %v5274_v1 = vld [vmem:[%s7485_s2 + $0x5a8] ss:$16 sps:$4 sm:$0xff]  }
  0x7c   :  { %1338 = vmatprep.subr.bf16.mxu0 %v5189_v2  ;;  %1502 = vmatprep.subr.bf16.mxu1 %v5192_v3  ;;  %v5279_v2 = vld [vmem:[%s7485_s2 + $0x5c4] ss:$16 sps:$4 sm:$0xff]   ;;  %v5282_v3 = vld [vmem:[%s7485_s2 + $0x5cc] ss:$16 sps:$4 sm:$0xff]  }
  0x7f   :  { %1339 = vmatpush1.bf16.msra.mxu0 %v5187_v4  ;;  %1503 = vmatpush1.bf16.msra.mxu1 %v5190_v5  ;;  %v5277_v4 = vld [vmem:[%s7485_s2 + $0x5c0] ss:$16 sps:$4 sm:$0xff]   ;;  %v5280_v5 = vld [vmem:[%s7485_s2 + $0x5c8] ss:$16 sps:$4 sm:$0xff]  }
  0x80   :  { %1349 = vmatprep.subr.bf16.mxu0 %v5195_v6  ;;  %1513 = vmatprep.subr.bf16.mxu1 %v5198_v8  ;;  %v5285_v6 = vld [vmem:[%s7485_s2 + $0x5e4] ss:$16 sps:$4 sm:$0xff]   ;;  %v5283_v8 = vld [vmem:[%s7485_s2 + $0x5e0] ss:$16 sps:$4 sm:$0xff]  }
  0x82   :  { %1341 = vmatmul.mubr.bf16.vlgmr.msra.gmra.mrb[0].mxu0 %v60_v10  ;;  %1505 = vmatmul.mubr.bf16.vlgmr.msra.gmra.mrb[0].mxu1 %v60_v10  ;;  %v55_v10 = vld [vmem:[%s7483_s0 + $0x20] sm:$0xff] }
  0x83   :  { %1350 = vmatpush1.bf16.msra.mxu0 %v5193_v9  ;;  %1514 = vmatpush1.bf16.msra.mxu1 %v5196_v11  ;;  %v5286_v9 = vld [vmem:[%s7485_s2 + $0x5e8] ss:$16 sps:$4 sm:$0xff]   ;;  %v5291_v11 = vld [vmem:[%s7485_s2 + $0x604] ss:$16 sps:$4 sm:$0xff]   ;;  %v62_v14 = vpack.c.bf16 %v55_v10, %v55_v10 }
  0x84   :  { %1351 = vmatprep.subr.bf16.mxu0 %v5201_v12  ;;  %1515 = vmatprep.subr.bf16.mxu1 %v5204_v13  ;;  %v5300_v12 = vld [vmem:[%s7487_s4 + $0xc0] sm:$0xff]  }
  0x85   :  { %1381 = vmatprep.mubr.bf16.mxu0 %v63_v15  ;;  %1545 = vmatprep.mubr.bf16.mxu1 %v63_v15  ;;  %v5289_v13 = vld [vmem:[%s7485_s2 + $0x600] ss:$16 sps:$4 sm:$0xff]   ;;  %v5294_v15 = vld [vmem:[%s7485_s2 + $0x60c] ss:$16 sps:$4 sm:$0xff]  }
  0x87   :  { %1352 = vmatpush1.bf16.msra.mxu0 %v5199_v16  ;;  %1516 = vmatpush1.bf16.msra.mxu1 %v5202_v17  ;;  %v5302_v16 = vld [vmem:[%s7487_s4 + $0x80] sm:$0xff]   ;;  %v5749_v17 = vmov 0  }
  0x88   :  { %1353 = vmatprep.subr.bf16.mxu0 %v5207_v18  ;;  %1517 = vmatprep.subr.bf16.mxu1 %v5210_v19  ;;  %v57_v18 = vld [vmem:[%s7483_s0 + $0x30] sm:$0xff]  ;;  %v5292_v19 = vld [vmem:[%s7485_s2 + $0x608] ss:$16 sps:$4 sm:$0xff]  }
  0x8b   :  { %1354 = vmatpush1.bf16.msra.mxu0 %v5205_v20  ;;  %1518 = vmatpush1.bf16.msra.mxu1 %v5208_v21  ;;  %v64_v20 = vpack.c.bf16 %v57_v18, %v57_v18  ;;  %v5295_v21 = vld [vmem:[%s7487_s4 + $0x40] sm:$0xff]  }
  0x8c   :  { %1355 = vmatprep.subr.bf16.mxu0 %v5213_v22  ;;  %1519 = vmatprep.subr.bf16.mxu1 %v5216_v23  ;;  %v5296_v22 = vld [vmem:[%s7487_s4] sm:$0xff]   ;;  %v5297_v23 = vld [vmem:[%s7487_s4 + $0x48] sm:$0xff]  }
  0x8f   :  { %1356 = vmatpush1.bf16.msra.mxu0 %v5211_v24  ;;  %1520 = vmatpush1.bf16.msra.mxu1 %v5214_v25  ;;  %v5298_v24 = vld [vmem:[%s7487_s4 + $0x8] sm:$0xff]   ;;  %v5299_v25 = vld [vmem:[%s7487_s4 + $0x50] sm:$0xff]  }
  0x90   :  { %1357 = vmatprep.subr.bf16.mxu0 %v5219_v26  ;;  %1521 = vmatprep.subr.bf16.mxu1 %v5222_v27  ;;  %v5301_v26 = vld [vmem:[%s7487_s4 + $0x10] sm:$0xff]  }
  0x93   :  { %1358 = vmatpush1.bf16.msra.mxu0 %v5217_v28  ;;  %1522 = vmatpush1.bf16.msra.mxu1 %v5220_v29 }
  0x94   :  { %1359 = vmatprep.subr.bf16.mxu0 %v5225_v30  ;;  %1523 = vmatprep.subr.bf16.mxu1 %v5228_v31 }
  0x97   :  { %1360 = vmatpush1.bf16.msra.mxu0 %v5223_v32  ;;  %1524 = vmatpush1.bf16.msra.mxu1 %v5226_v33 }
  0x98   :  { %1361 = vmatprep.subr.bf16.mxu0 %v5231_v34  ;;  %1525 = vmatprep.subr.bf16.mxu1 %v5234_v35 }
  0x9b   :  { %1362 = vmatpush1.bf16.msra.mxu0 %v5229_v36  ;;  %1526 = vmatpush1.bf16.msra.mxu1 %v5232_v37 }
  0x9c   :  { %1363 = vmatprep.subr.bf16.mxu0 %v5237_v38  ;;  %1527 = vmatprep.subr.bf16.mxu1 %v5240_v39 }
  0x9f   :  { %1364 = vmatpush1.bf16.msra.mxu0 %v5235_v40  ;;  %1528 = vmatpush1.bf16.msra.mxu1 %v5238_v41 }
  0xa0   :  { %1365 = vmatprep.subr.bf16.mxu0 %v5243_v42  ;;  %1529 = vmatprep.subr.bf16.mxu1 %v5246_v43 }
  0xa3   :  { %1366 = vmatpush1.bf16.msra.mxu0 %v5241_v44  ;;  %1530 = vmatpush1.bf16.msra.mxu1 %v5244_v45 }
  0xa4   :  { %1367 = vmatprep.subr.bf16.mxu0 %v5249_v46  ;;  %1531 = vmatprep.subr.bf16.mxu1 %v5252_v47 }
  0xa7   :  { %1368 = vmatpush1.bf16.msra.mxu0 %v5247_v48  ;;  %1532 = vmatpush1.bf16.msra.mxu1 %v5250_v49 }
  0xa8   :  { %1369 = vmatprep.subr.bf16.mxu0 %v5255_v50  ;;  %1533 = vmatprep.subr.bf16.mxu1 %v5258_v51 }
  0xab   :  { %1370 = vmatpush1.bf16.msra.mxu0 %v5253_v52  ;;  %1534 = vmatpush1.bf16.msra.mxu1 %v5256_v53 }
  0xac   :  { %1371 = vmatprep.subr.bf16.mxu0 %v5261_v54  ;;  %1535 = vmatprep.subr.bf16.mxu1 %v5264_v55 }
  0xaf   :  { %1372 = vmatpush1.bf16.msra.mxu0 %v5259_v56  ;;  %1536 = vmatpush1.bf16.msra.mxu1 %v5262_v57 }
  0xb0   :  { %1373 = vmatprep.subr.bf16.mxu0 %v5267_v58  ;;  %1537 = vmatprep.subr.bf16.mxu1 %v5270_v59 }
  0xb3   :  { %1374 = vmatpush1.bf16.msra.mxu0 %v5265_v60  ;;  %1538 = vmatpush1.bf16.msra.mxu1 %v5268_v61 }
  0xb4   :  { %1375 = vmatprep.subr.bf16.mxu0 %v5273_v62  ;;  %1539 = vmatprep.subr.bf16.mxu1 %v5276_v63 }
  0xb7   :  { %1376 = vmatpush1.bf16.msra.mxu0 %v5271_v0  ;;  %1540 = vmatpush1.bf16.msra.mxu1 %v5274_v1 }
  0xb8   :  { %1377 = vmatprep.subr.bf16.mxu0 %v5279_v2  ;;  %1541 = vmatprep.subr.bf16.mxu1 %v5282_v3 }
  0xbb   :  { %1378 = vmatpush1.bf16.msra.mxu0 %v5277_v4  ;;  %1542 = vmatpush1.bf16.msra.mxu1 %v5280_v5 }
  0xbc   :  { %1379 = vmatprep.subr.bf16.mxu0 %v5285_v6  ;;  %1543 = vmatprep.subr.bf16.mxu1 %v5288_v7 }
  0xbf   :  { %1380 = vmatpush1.bf16.msra.mxu0 %v5283_v8  ;;  %1544 = vmatpush1.bf16.msra.mxu1 %v5286_v9 }
  0xc0   :  { %1390 = vmatprep.subr.bf16.mxu0 %v5291_v11  ;;  %4802 = vmatprep.subr.bf16.mxu1 %v5300_v12 }
  0xc2   :  { %1382 = vmatmul.mubr.bf16.vlgmr.msra.gmra.mrb[0].mxu0 %v62_v14  ;;  %1546 = vmatmul.mubr.bf16.vlgmr.msra.gmra.mrb[0].mxu1 %v62_v14 }
  0xc3   :  { %1391 = vmatpush1.bf16.msra.mxu0 %v5289_v13  ;;  %1422 = vmatprep.mubr.bf16.mxu0 %v5749_v17 }
  0xc4   :  { %1554 = vmatprep.subr.bf16.mxu0 %v5294_v15  ;;  %4803 = vmatpush3.bf16.msra.mxu1 %v5302_v16 }
  0xce   :  { %4478 = vmatmul.mubr.msk.bf16.vlgmr.msra.gmra.mrb[0].mxu0 %vm1263_vm0, %v64_v20 }
  0xcf   :  { %1555 = vmatpush1.bf16.msra.mxu0 %v5292_v19  ;;  %1586 = vmatprep.mubr.bf16.mxu0 %v5749_v17 }
  0xd0   :  { %4780 = vmatprep.subr.bf16.mxu0 %v5295_v21 }
  0xd6   :  { %4479 = vmatmul.mubr.msk.bf16.vlgmr.msra.gmra.mrb[4].mxu0 %vm1263_vm0, %v64_v20 }
  0xd7   :  { %4781 = vmatpush3.bf16.msra.mxu0 %v5296_v22 }
  0xd8   :  { %4782 = vmatprep.subr.bf16.mxu0 %v5297_v23 }
  0xdb   :  { %4783 = vmatpush3.bf16.msra.mxu0 %v5298_v24 }
  0xdc   :  { %4784 = vmatprep.subr.bf16.mxu0 %v5299_v25 }
  0xdf   :  { %4785 = vmatpush3.bf16.msra.mxu0 %v5301_v26 }
  0xe0   :  { %21 = vsyncpa [#allocation3], 0  ;;  %v5303_v27 = vld [vmem:[%s7487_s4 + $0x58] sm:$0xff]   ;;  %v5304_v28 = vld [vmem:[%s7487_s4 + $0xc8] sm:$0xff]   ;;  %v5750_v51 = vmov 0.0|0.0   ;;  %v263_v52 = vlaneseq  ;;  %vm5751_vm1 = vmmov 0  }
  0xe1   :  { %v5305_v29 = vld [vmem:[%s7487_s4 + $0x18] sm:$0xff]   ;;  %v5306_v30 = vld [vmem:[%s7487_s4 + $0x88] sm:$0xff]   ;;  %4786 = vmatprep.subr.bf16.mxu0 %v5303_v27  ;;  %4804 = vmatprep.subr.bf16.mxu1 %v5304_v28  ;;  %v5307_v31 = vld [vmem:[%s7487_s4 + $0x60] sm:$0xff]   ;;  %vm2040_vm2 = vcmask 31744   ;;  %vm2064_vm3 = vcmask 1041408   ;;  %s5753_s26 = smov 126  }
  0xe2   :  { %4805 = vmatpush3.bf16.msra.mxu1 %v5306_v30  ;;  %v5308_v32 = vld [vmem:[%s7487_s4 + $0xd0] sm:$0xff]   ;;  %v5309_v33 = vld [vmem:[%s7487_s4 + $0x20] sm:$0xff]   ;;  %v5311_v35 = vld [vmem:[%s7487_s4 + $0x68] sm:$0xff]   ;;  %v6545_v56 = vshrl.u32 %v263_v52, 7  ;;  %vm2060_vm4 = vcmask 15360  }
  0xe3   :  { %4787 = vmatpush3.bf16.msra.mxu0 %v5305_v29  ;;  %v5310_v34 = vld [vmem:[%s7487_s4 + $0x90] sm:$0xff]   ;;  %v5312_v36 = vld [vmem:[%s7487_s4 + $0xd8] sm:$0xff]   ;;  %4806 = vmatprep.subr.bf16.mxu1 %v5308_v32  ;;  %v5313_v37 = vld [vmem:[%s7487_s4 + $0x28] sm:$0xff]  }
  0xe4   :  { %4788 = vmatprep.subr.bf16.mxu0 %v5307_v31  ;;  %v5314_v38 = vld [vmem:[%s7487_s4 + $0x98] sm:$0xff]   ;;  %v5315_v39 = vld [vmem:[%s7487_s4 + $0x70] sm:$0xff]   ;;  %v5316_v40 = vld [vmem:[%s7487_s4 + $0xe0] sm:$0xff]   ;;  %v6548_v58 = vsub.s32 0, %v6545_v56  ;;  %v6551_v59 = vsub.s32 1, %v6545_v56  ;;  %v6559_v63 = vsub.s32 2, %v6545_v56 }
  0xe5   :  { %v5317_v41 = vld [vmem:[%s7487_s4 + $0x30] sm:$0xff]   ;;  %v5318_v42 = vld [vmem:[%s7487_s4 + $0xa0] sm:$0xff]   ;;  %v5319_v43 = vld [vmem:[%s7487_s4 + $0x78] sm:$0xff]   ;;  %v6562_v0 = vsub.s32 3, %v6545_v56 }
  0xe6   :  { %4807 = vmatpush3.bf16.msra.mxu1 %v5310_v34  ;;  %v5320_v44 = vld [vmem:[%s7487_s4 + $0xe8] sm:$0xff]   ;;  %v5321_v45 = vld [vmem:[%s7487_s4 + $0x38] sm:$0xff]   ;;  %v5323_v47 = vld [vmem:[%s7487_s4 + $0xf0] sm:$0xff]  }
  0xe7   :  { %4789 = vmatpush3.bf16.msra.mxu0 %v5309_v33  ;;  %4808 = vmatprep.subr.bf16.mxu1 %v5312_v36  ;;  %v5322_v46 = vld [vmem:[%s7487_s4 + $0xa8] sm:$0xff]   ;;  %v5324_v48 = vld [vmem:[%s7487_s4 + $0xb0] sm:$0xff]   ;;  %v5325_v49 = vld [vmem:[%s7487_s4 + $0xf8] sm:$0xff]  }
  0xe8   :  { %4790 = vmatprep.subr.bf16.mxu0 %v5311_v35  ;;  %v5326_v50 = vld [vmem:[%s7487_s4 + $0xb8] sm:$0xff]   ;;  %v261_v60 = vld [vmem:[%s7486_s3] sm:$0xf]  ;;  %v1948_v10 = vld [vmem:[%s7489_s6 + $0x8] sm:$0xff] }
  0xe9   :  { %v266_v61 = vrot.slane %v261_v60, %v6548_v58  ;;  %v270_v62 = vrot.slane %v261_v60, %v6551_v59  ;;  %v274_v6 = vrot.slane %v261_v60, %v6559_v63  ;;  %v1947_v9 = vld [vmem:[%s7489_s6] sm:$0xff]  ;;  %v278_v11 = vrot.slane %v261_v60, %v6562_v0  ;;  %v1949_v18 = vld [vmem:[%s7489_s6 + $0x10] sm:$0xff]  ;;  %v1950_v19 = vld [vmem:[%s7489_s6 + $0x18] sm:$0xff] }
  0xea   :  { %4809 = vmatpush3.bf16.msra.mxu1 %v5314_v38  ;;  %v4928_v14 = vpack.c.bf16 %v1948_v10, %v1947_v9  ;;  %v4931_v26 = vpack.c.bf16 %v1950_v19, %v1949_v18  ;;  %v1951_v29 = vld [vmem:[%s7489_s6 + $0x20] sm:$0xff]  ;;  %v1952_v30 = vld [vmem:[%s7489_s6 + $0x28] sm:$0xff]  ;;  %v1953_v35 = vld [vmem:[%s7489_s6 + $0x30] sm:$0xff] }
  0xeb   :  { %4791 = vmatpush3.bf16.msra.mxu0 %v5313_v37  ;;  %4810 = vmatprep.subr.bf16.mxu1 %v5316_v40  ;;  %v4934_v33 = vpack.c.bf16 %v1952_v30, %v1951_v29  ;;  %v1954_v36 = vld [vmem:[%s7489_s6 + $0x38] sm:$0xff]  ;;  %v1955_v38 = vld [vmem:[%s7489_s6 + $0x40] sm:$0xff] }
  0xec   :  { %4792 = vmatprep.subr.bf16.mxu0 %v5315_v39  ;;  %v4937_v37 = vpack.c.bf16 %v1954_v36, %v1953_v35  ;;  %v1956_v39 = vld [vmem:[%s7489_s6 + $0x48] sm:$0xff]  ;;  %v5333_v18 = vld [vmem:[%s7493_s10 + $0x20] ss:$16 sps:$4 sm:$0xff]   ;;  %v5341_v19 = vld [vmem:[%s7493_s10 + $0x44] ss:$16 sps:$4 sm:$0xff]  }
  0xed   :  { %v4940_v40 = vpack.c.bf16 %v1956_v39, %v1955_v38  ;;  %v5363_v29 = vld [vmem:[%s7493_s10 + $0xc0] ss:$16 sps:$4 sm:$0xff]   ;;  %v5338_v35 = vld [vmem:[%s7493_s10 + $0x2c] ss:$16 sps:$4 sm:$0xff]   ;;  %v5336_v36 = vld [vmem:[%s7493_s10 + $0x28] ss:$16 sps:$4 sm:$0xff]  }
  0xee   :  { %4811 = vmatpush3.bf16.msra.mxu1 %v5318_v42  ;;  %v1958_v42 = vld [vmem:[%s7489_s6 + $0x58] sm:$0xff]  ;;  %v2042_v30 = vld [vmem:[%s7484_s1] sm:$0xff] }
  0xef   :  { %4793 = vmatpush3.bf16.msra.mxu0 %v5317_v41  ;;  %4812 = vmatprep.subr.bf16.mxu1 %v5320_v44  ;;  %v1957_v41 = vld [vmem:[%s7489_s6 + $0x50] sm:$0xff]  ;;  %v1959_v44 = vld [vmem:[%s7489_s6 + $0x60] sm:$0xff]  ;;  %v5342_v38 = vld [vmem:[%s7493_s10 + $0x48] ss:$16 sps:$4 sm:$0xff]  }
  0xf0   :  { %4794 = vmatprep.subr.bf16.mxu0 %v5319_v43  ;;  %v4943_v43 = vpack.c.bf16 %v1958_v42, %v1957_v41  ;;  %v5350_v39 = vld [vmem:[%s7493_s10 + $0x6c] ss:$16 sps:$4 sm:$0xff]   ;;  %v5354_v41 = vld [vmem:[%s7493_s10 + $0x88] ss:$16 sps:$4 sm:$0xff]  }
  0xf1   :  { %v5362_v42 = vld [vmem:[%s7493_s10 + $0xac] ss:$16 sps:$4 sm:$0xff]  }
  0xf2   :  { %4813 = vmatpush3.bf16.msra.mxu1 %v5322_v46 }
  0xf3   :  { %4795 = vmatpush3.bf16.msra.mxu0 %v5321_v45  ;;  %4814 = vmatprep.subr.bf16.mxu1 %v5323_v47  ;;  %v1960_v45 = vld [vmem:[%s7489_s6 + $0x68] sm:$0xff]  ;;  %v1961_v47 = vld [vmem:[%s7489_s6 + $0x70] sm:$0xff] }
  0xf4   :  { %4927 = vmatprep.subr.bf16.mxu0 %v5750_v51  ;;  %v4946_v46 = vpack.c.bf16 %v1960_v45, %v1959_v44  ;;  %v5368_v44 = vld [vmem:[%s7493_s10 + $0xcc] ss:$16 sps:$4 sm:$0xff]   ;;  %v5366_v45 = vld [vmem:[%s7493_s10 + $0xc8] ss:$16 sps:$4 sm:$0xff]  }
  0xf6   :  { %4815 = vmatpush3.bf16.msra.mxu1 %v5324_v48  ;;  %v1962_v48 = vld [vmem:[%s7489_s6 + $0x78] sm:$0xff] }
  0xf7   :  { %4816 = vmatprep.subr.bf16.mxu1 %v5325_v49  ;;  %v4949_v49 = vpack.c.bf16 %v1962_v48, %v1961_v47  ;;  %v5374_v47 = vld [vmem:[%s7493_s10 + $0xec] ss:$16 sps:$4 sm:$0xff]   ;;  %v5369_v48 = vld [vmem:[%s7493_s10 + $0xe0] ss:$16 sps:$4 sm:$0xff]  }
  0xfa   :  { %4817 = vmatpush3.bf16.msra.mxu1 %v5326_v50  ;;  %v5752_v50 = vmov 0.0  }
 0x195   :  { %v1547_v53 = vpop.f32.mrb[0].mxu1 }
 0x196   :  { %v1549_v54 = vpop.f32.mrb[1].mxu1  ;;  %v4953_v15 = vadd.f32 %v1547_v53, %v274_v6  ;;  %v4513_v6 = vld [vmem:[%s7490_s7] ss:$0 sm:$0xff] }
 0x197   :  { %v1551_v55 = vpop.f32.mrb[2].mxu1  ;;  %v4955_v20 = vadd.f32 %v1549_v54, %v278_v11 }
 0x198   :  { %v1552_v57 = vpop.f32.mrb[3].mxu1 }
 0x199   :  { %v4480_v57 = vld [vmem:[%s7488_s5] ss:$0 sm:$0xff] }
 0x1a1   :  { %v1424_v1 = vpop.f32.mrb[0].mxu0 }
 0x1a2   :  { %v4951_v2 = vadd.f32 %v1424_v1, %v266_v61  ;;  %v1426_v3 = vpop.f32.mrb[1].mxu0 }
 0x1a3   :  { %v4952_v4 = vadd.f32 %v1426_v3, %v270_v62  ;;  %v1428_v5 = vpop.f32.mrb[2].mxu0 }
 0x1a4   :  { %v1595_v7 = vmax.f32 %v4951_v2, 0.0  ;;  %v1429_v8 = vpop.f32.mrb[3].mxu0 }
 0x1a5   :  { %v1596_v12 = vmax.f32 %v4952_v4, 0.0 }
 0x1a6   :  { %v1599_v16 = vpack.c.bf16 %v1595_v7, %v1595_v7 }
 0x1a7   :  { %v1600_v13 = vpack.c.bf16 %v1596_v12, %v1596_v12  ;;  %v2052_v12 = vld [vmem:[%s7491_s8] sm:$0x3] }
 0x1a9   :  { %v1588_v21 = vpop.f32.mrb[4].mxu0  ;;  %1898 = vmatprep.mubr.bf16.mxu0 %v1600_v13  ;;  %v5327_v13 = vld [vmem:[%s7493_s10] ss:$16 sps:$4 sm:$0xff]  }
 0x1aa   :  { %v4954_v22 = vadd.f32 %v4953_v15, %v1588_v21  ;;  %v1590_v23 = vpop.f32.mrb[5].mxu0  ;;  %1899 = vmatmul.mubr.bf16.vlgmr.msra.gmra.mrb[8].mxu0 %v1599_v16  ;;  %v5332_v15 = vld [vmem:[%s7493_s10 + $0xc] ss:$16 sps:$4 sm:$0xff]   ;;  %v5335_v16 = vld [vmem:[%s7493_s10 + $0x24] ss:$16 sps:$4 sm:$0xff]  }
 0x1ab   :  { %v4956_v24 = vadd.f32 %v4955_v20, %v1590_v23  ;;  %v1592_v25 = vpop.f32.mrb[6].mxu0  ;;  %4929 = vmatpush3.bf16.msra.mxu0 %v4928_v14  ;;  %4919 = vmatprep.mubr.msk.f32.mxu0 %vm5751_vm1, %v5752_v50  ;;  %v5329_v14 = vld [vmem:[%s7493_s10 + $0x4] ss:$16 sps:$4 sm:$0xff]   ;;  %v5339_v20 = vld [vmem:[%s7493_s10 + $0x40] ss:$16 sps:$4 sm:$0xff]  }
 0x1ac   :  { %v1597_v27 = vmax.f32 %v4954_v22, 0.0  ;;  %v1593_v28 = vpop.f32.mrb[7].mxu0  ;;  %4930 = vmatprep.subr.bf16.mxu0 %v5750_v51  ;;  %2354 = vmatprep.subr.bf16.mxu1 %v5329_v14  ;;  %v5347_v22 = vld [vmem:[%s7493_s10 + $0x64] ss:$16 sps:$4 sm:$0xff]   ;;  %v5345_v23 = vld [vmem:[%s7493_s10 + $0x60] ss:$16 sps:$4 sm:$0xff]  }
 0x1ad   :  { %v1598_v31 = vmax.f32 %v4956_v24, 0.0  ;;  %v5353_v24 = vld [vmem:[%s7493_s10 + $0x84] ss:$16 sps:$4 sm:$0xff]   ;;  %v5351_v25 = vld [vmem:[%s7493_s10 + $0x80] ss:$16 sps:$4 sm:$0xff]  }
 0x1ae   :  { %v1601_v34 = vpack.c.bf16 %v1597_v27, %v1597_v27  ;;  %v5357_v27 = vld [vmem:[%s7493_s10 + $0xa0] ss:$16 sps:$4 sm:$0xff]   ;;  %v5365_v28 = vld [vmem:[%s7493_s10 + $0xc4] ss:$16 sps:$4 sm:$0xff]   ;;  %v5404_v14 = vld [vmem:[%s7495_s12 + $0xec] ss:$28 sps:$4 sm:$0xff]  }
 0x1af   :  { %v1602_v32 = vpack.c.bf16 %v1598_v31, %v1598_v31  ;;  %4932 = vmatpush3.bf16.msra.mxu0 %v4931_v26  ;;  %v5359_v26 = vld [vmem:[%s7493_s10 + $0xa4] ss:$16 sps:$4 sm:$0xff]  }
 0x1b0   :  { %4933 = vmatprep.subr.bf16.mxu0 %v5750_v51 }
 0x1b1   :  { %1938 = vmatprep.mubr.bf16.mxu1 %v1602_v32 }
 0x1b2   :  { %1939 = vmatmul.mubr.bf16.vlgmr.msra.gmra.mrb[4].mxu1 %v1601_v34 }
 0x1b3   :  { %4935 = vmatpush3.bf16.msra.mxu0 %v4934_v33  ;;  %2386 = vmatprep.mubr.bf16.mxu1 %v5749_v17  ;;  %v5330_v33 = vld [vmem:[%s7493_s10 + $0x8] ss:$16 sps:$4 sm:$0xff]  }
 0x1b4   :  { %4936 = vmatprep.subr.bf16.mxu0 %v5750_v51  ;;  %2355 = vmatpush1.bf16.msra.mxu1 %v5327_v13  ;;  %v5401_v13 = vld [vmem:[%s7495_s12 + $0xe4] ss:$28 sps:$4 sm:$0xff]  }
 0x1b5   :  { %2356 = vmatprep.subr.bf16.mxu1 %v5335_v16  ;;  %v5402_v16 = vld [vmem:[%s7495_s12 + $0xe8] ss:$28 sps:$4 sm:$0xff]  }
 0x1b7   :  { %4938 = vmatpush3.bf16.msra.mxu0 %v4937_v37  ;;  %v5344_v37 = vld [vmem:[%s7493_s10 + $0x4c] ss:$16 sps:$4 sm:$0xff]  }
 0x1b8   :  { %4939 = vmatprep.subr.bf16.mxu0 %v5750_v51  ;;  %2357 = vmatpush1.bf16.msra.mxu1 %v5333_v18  ;;  %v5407_v18 = vld [vmem:[%s7495_s12 + $0x11c] ss:$28 sps:$4 sm:$0xff]  }
 0x1b9   :  { %2358 = vmatprep.subr.bf16.mxu1 %v5341_v19  ;;  %v5410_v19 = vld [vmem:[%s7495_s12 + $0x124] ss:$28 sps:$4 sm:$0xff]  }
 0x1bb   :  { %4941 = vmatpush3.bf16.msra.mxu0 %v4940_v40  ;;  %v5356_v40 = vld [vmem:[%s7493_s10 + $0x8c] ss:$16 sps:$4 sm:$0xff]  }
 0x1bc   :  { %4942 = vmatprep.subr.bf16.mxu0 %v5750_v51  ;;  %2359 = vmatpush1.bf16.msra.mxu1 %v5339_v20  ;;  %v5405_v20 = vld [vmem:[%s7495_s12 + $0x118] ss:$28 sps:$4 sm:$0xff]  }
 0x1bd   :  { %2360 = vmatprep.subr.bf16.mxu1 %v5347_v22  ;;  %v5413_v22 = vld [vmem:[%s7495_s12 + $0x154] ss:$28 sps:$4 sm:$0xff]  }
 0x1bf   :  { %4944 = vmatpush3.bf16.msra.mxu0 %v4943_v43  ;;  %v5360_v43 = vld [vmem:[%s7493_s10 + $0xa8] ss:$16 sps:$4 sm:$0xff]  }
 0x1c0   :  { %4945 = vmatprep.subr.bf16.mxu0 %v5750_v51  ;;  %2361 = vmatpush1.bf16.msra.mxu1 %v5345_v23  ;;  %v5416_v23 = vld [vmem:[%s7495_s12 + $0x15c] ss:$28 sps:$4 sm:$0xff]  }
 0x1c1   :  { %2362 = vmatprep.subr.bf16.mxu1 %v5353_v24  ;;  %v5411_v24 = vld [vmem:[%s7495_s12 + $0x150] ss:$28 sps:$4 sm:$0xff]  }
 0x1c3   :  { %4947 = vmatpush3.bf16.msra.mxu0 %v4946_v46  ;;  %v5371_v46 = vld [vmem:[%s7493_s10 + $0xe4] ss:$16 sps:$4 sm:$0xff]  }
 0x1c4   :  { %4948 = vmatprep.subr.bf16.mxu0 %v5750_v51  ;;  %2363 = vmatpush1.bf16.msra.mxu1 %v5351_v25  ;;  %v5414_v25 = vld [vmem:[%s7495_s12 + $0x158] ss:$28 sps:$4 sm:$0xff]  }
 0x1c5   :  { %2364 = vmatprep.subr.bf16.mxu1 %v5359_v26  ;;  %v5419_v26 = vld [vmem:[%s7495_s12 + $0x18c] ss:$28 sps:$4 sm:$0xff]  }
 0x1c7   :  { %4950 = vmatpush3.bf16.msra.mxu0 %v4949_v49  ;;  %v5372_v49 = vld [vmem:[%s7493_s10 + $0xe8] ss:$16 sps:$4 sm:$0xff]  }
 0x1c8   :  { %4922 = vmatprep.subr.mxu0 %v5752_v50  ;;  %2365 = vmatpush1.bf16.msra.mxu1 %v5357_v27  ;;  %v5422_v27 = vld [vmem:[%s7495_s12 + $0x194] ss:$28 sps:$4 sm:$0xff]  }
 0x1c9   :  { %2366 = vmatprep.subr.bf16.mxu1 %v5365_v28  ;;  %v5417_v28 = vld [vmem:[%s7495_s12 + $0x188] ss:$28 sps:$4 sm:$0xff]  }
 0x1cc   :  { %2367 = vmatpush1.bf16.msra.mxu1 %v5363_v29  ;;  %v5420_v29 = vld [vmem:[%s7495_s12 + $0x190] ss:$28 sps:$4 sm:$0xff]  }
 0x1cd   :  { %2368 = vmatprep.subr.bf16.mxu1 %v5371_v46  ;;  %v5452_v46 = vld [vmem:[%s7495_s12 + $0x2ac] ss:$28 sps:$4 sm:$0xff]  }
 0x1d0   :  { %2369 = vmatpush1.bf16.msra.mxu1 %v5369_v48  ;;  %v5450_v48 = vld [vmem:[%s7495_s12 + $0x2a8] ss:$28 sps:$4 sm:$0xff]  }
 0x27d   :  { %v4796_v52 = vpop.f32.mrb[8].mxu0 }
 0x27e   :  { %v4797_v53 = vpop.f32.mrb[9].mxu0 }
 0x27f   :  { %v4798_v54 = vadd.f32 %v4797_v53, %v4796_v52  ;;  %v4799_v55 = vpop.f32.mrb[10].mxu0  ;;  %v5380_v52 = vld [vmem:[%s7495_s12 + $0xc] ss:$28 sps:$4 sm:$0xff]   ;;  %v4514_v53 = vld [vmem:[%s7492_s9] ss:$0 sm:$0xff] }
 0x280   :  { %v4800_v51 = vpop.f32.mrb[11].mxu0 }
 0x281   :  { %v1901_v62 = vadd.f32 %v4798_v54, %v4480_v57 }
 0x285   :  { %v4818_v60 = vpop.f32.mrb[4].mxu1 }
 0x286   :  { %v4819_v61 = vpop.f32.mrb[5].mxu1 }
 0x287   :  { %v4820_v1 = vadd.f32 %v4819_v61, %v4818_v60  ;;  %v4821_v2 = vpop.f32.mrb[6].mxu1  ;;  %v5375_v60 = vld [vmem:[%s7495_s12] ss:$28 sps:$4 sm:$0xff]   ;;  %v5378_v61 = vld [vmem:[%s7495_s12 + $0x8] ss:$28 sps:$4 sm:$0xff]  }
 0x288   :  { %v4822_v3 = vpop.f32.mrb[7].mxu1  ;;  %v5386_v2 = vld [vmem:[%s7495_s12 + $0x44] ss:$28 sps:$4 sm:$0xff]  }
 0x289   :  { %v1941_v4 = vadd.f32 %v4820_v1, %v1901_v62  ;;  %v5383_v1 = vld [vmem:[%s7495_s12 + $0x3c] ss:$28 sps:$4 sm:$0xff]  }
 0x28a   :  { %v5381_v3 = vld [vmem:[%s7495_s12 + $0x38] ss:$28 sps:$4 sm:$0xff]  }
 0x28b   :  { %v1946_v5 = vmax.f32 %v1941_v4, 0.0  ;;  %v5384_v4 = vld [vmem:[%s7495_s12 + $0x40] ss:$28 sps:$4 sm:$0xff]  }
 0x28d   :  { %4920 = vmatmul.mubr.f32.vlgmr.msra.gmra.mrb[12].mxu0 %v1946_v5  ;;  %v5389_v5 = vld [vmem:[%s7495_s12 + $0x74] ss:$28 sps:$4 sm:$0xff]  }
 0x28e   :  { %4924 = vmatprep.mubr.msk.f32.mxu0 %vm5751_vm1, %v5752_v50  ;;  %4923 = vmatpush3.msk.msra.mxu0 %vm2064_vm3, %v2052_v12  ;;  %v5377_v50 = vld [vmem:[%s7495_s12 + $0x4] ss:$28 sps:$4 sm:$0xff]   ;;  %v5396_v12 = vld [vmem:[%s7495_s12 + $0xb0] ss:$28 sps:$4 sm:$0xff]  }
 0x28f   :  { %2395 = vmatprep.subr.bf16.mxu0 %v5332_v15  ;;  %3889 = vmatprep.subr.bf16.mxu1 %v5377_v50  ;;  %v5399_v15 = vld [vmem:[%s7495_s12 + $0xe0] ss:$28 sps:$4 sm:$0xff]  }
 0x290   :  { %v5458_v50 = vld [vmem:[%s7495_s12 + $0x2e4] ss:$28 sps:$4 sm:$0xff]  }
 0x360   :  { %v2036_v7 = vpop.f32.mrb[12].mxu0 }
 0x361   :  { %v2037_v8 = vadd.f32 %v4513_v6, %v2036_v7  ;;  %v4921_v9 = vpop.f32.mrb[13].mxu0  ;;  %v5392_v6 = vld [vmem:[%s7495_s12 + $0x7c] ss:$28 sps:$4 sm:$0xff]   ;;  %v5387_v7 = vld [vmem:[%s7495_s12 + $0x70] ss:$28 sps:$4 sm:$0xff]  }
 0x362   :  { %v5395_v9 = vld [vmem:[%s7495_s12 + $0xac] ss:$28 sps:$4 sm:$0xff]  }
 0x363   :  { %2041 = vst.msk [vmem:[%s7498_s15] sm:$0xff] %vm2040_vm2, %v2037_v8  ;;  %v2043_v10 = vmul.f32 0.5, %v2037_v8 }
 0x365   :  { %v2044_v11 = vmul.f32 1.442695, %v2043_v10  ;;  %v5398_v10 = vld [vmem:[%s7495_s12 + $0xb4] ss:$28 sps:$4 sm:$0xff]  }
 0x367   :  { %5695 = vpow2.f32 %v2044_v11  ;;  %v5393_v11 = vld [vmem:[%s7495_s12 + $0xa8] ss:$28 sps:$4 sm:$0xff]  }
 0x371   :  { %v5696_v21 = vpop.eup %5695 }
 0x372   :  { %2047 = vrot.lane.b32.xlu0 %v5696_v21, %s5753_s26  ;;  %v5408_v21 = vld [vmem:[%s7495_s12 + $0x120] ss:$28 sps:$4 sm:$0xff]  }
 0x3e4   :  { %v2048_v31 = vpop.permute.xlu0 %2047 }
 0x3e5   :  { %v2050_v32 = vmul.f32 %v2048_v31, %v2042_v30  ;;  %v5425_v30 = vld [vmem:[%s7495_s12 + $0x1c4] ss:$28 sps:$4 sm:$0xff]   ;;  %v5428_v31 = vld [vmem:[%s7495_s12 + $0x1cc] ss:$28 sps:$4 sm:$0xff]  }
 0x3e7   :  { %v2051_v34 = vadd.f32 %v2050_v32, %v2037_v8  ;;  %v5390_v8 = vld [vmem:[%s7495_s12 + $0x78] ss:$28 sps:$4 sm:$0xff]   ;;  %v5423_v32 = vld [vmem:[%s7495_s12 + $0x1c0] ss:$28 sps:$4 sm:$0xff]  }
 0x3e9   :  { %4925 = vmatmul.mubr.msk.f32.vlgmr.msra.gmra.mrb[14].mxu0 %vm2060_vm4, %v2051_v34  ;;  %v5431_v34 = vld [vmem:[%s7495_s12 + $0x1fc] ss:$28 sps:$4 sm:$0xff]  }
 0x3ea   :  { %2396 = vmatpush1.bf16.msra.mxu0 %v5330_v33  ;;  %2427 = vmatprep.mubr.bf16.mxu0 %v5749_v17  ;;  %v5348_v17 = vld [vmem:[%s7493_s10 + $0x68] ss:$16 sps:$4 sm:$0xff]  }
 0x3eb   :  { %2397 = vmatprep.subr.bf16.mxu0 %v5338_v35  ;;  %v5426_v33 = vld [vmem:[%s7495_s12 + $0x1c8] ss:$28 sps:$4 sm:$0xff]  }
 0x3ec   :  { %v5434_v35 = vld [vmem:[%s7495_s12 + $0x204] ss:$28 sps:$4 sm:$0xff]  }
 0x3ee   :  { %2398 = vmatpush1.bf16.msra.mxu0 %v5336_v36  ;;  %v5429_v36 = vld [vmem:[%s7495_s12 + $0x1f8] ss:$28 sps:$4 sm:$0xff]  }
 0x3ef   :  { %2399 = vmatprep.subr.bf16.mxu0 %v5344_v37  ;;  %v5432_v37 = vld [vmem:[%s7495_s12 + $0x200] ss:$28 sps:$4 sm:$0xff]  }
 0x3f2   :  { %2400 = vmatpush1.bf16.msra.mxu0 %v5342_v38  ;;  %v5437_v38 = vld [vmem:[%s7495_s12 + $0x234] ss:$28 sps:$4 sm:$0xff]  }
 0x3f3   :  { %2401 = vmatprep.subr.bf16.mxu0 %v5350_v39  ;;  %v5440_v39 = vld [vmem:[%s7495_s12 + $0x23c] ss:$28 sps:$4 sm:$0xff]  }
 0x3f6   :  { %2402 = vmatpush1.bf16.msra.mxu0 %v5348_v17  ;;  %v5435_v17 = vld [vmem:[%s7495_s12 + $0x230] ss:$28 sps:$4 sm:$0xff]  }
 0x3f7   :  { %2403 = vmatprep.subr.bf16.mxu0 %v5356_v40  ;;  %v5438_v40 = vld [vmem:[%s7495_s12 + $0x238] ss:$28 sps:$4 sm:$0xff]  }
 0x3fa   :  { %2404 = vmatpush1.bf16.msra.mxu0 %v5354_v41  ;;  %v5443_v41 = vld [vmem:[%s7495_s12 + $0x26c] ss:$28 sps:$4 sm:$0xff]  }
 0x3fb   :  { %2405 = vmatprep.subr.bf16.mxu0 %v5362_v42  ;;  %v5446_v42 = vld [vmem:[%s7495_s12 + $0x274] ss:$28 sps:$4 sm:$0xff]  }
 0x3fe   :  { %2406 = vmatpush1.bf16.msra.mxu0 %v5360_v43  ;;  %v5441_v43 = vld [vmem:[%s7495_s12 + $0x268] ss:$28 sps:$4 sm:$0xff]  }
 0x3ff   :  { %2407 = vmatprep.subr.bf16.mxu0 %v5368_v44  ;;  %v5444_v44 = vld [vmem:[%s7495_s12 + $0x270] ss:$28 sps:$4 sm:$0xff]  }
 0x402   :  { %2408 = vmatpush1.bf16.msra.mxu0 %v5366_v45  ;;  %v5449_v45 = vld [vmem:[%s7495_s12 + $0x2a4] ss:$28 sps:$4 sm:$0xff]  }
 0x403   :  { %2409 = vmatprep.subr.bf16.mxu0 %v5374_v47  ;;  %v5447_v47 = vld [vmem:[%s7495_s12 + $0x2a0] ss:$28 sps:$4 sm:$0xff]  }
 0x406   :  { %2410 = vmatpush1.bf16.msra.mxu0 %v5372_v49  ;;  %v5455_v49 = vld [vmem:[%s7495_s12 + $0x2dc] ss:$28 sps:$4 sm:$0xff]  }
 0x407   :  { %3971 = vmatprep.subr.bf16.mxu0 %v5380_v52  ;;  %v5453_v52 = vld [vmem:[%s7495_s12 + $0x2d8] ss:$28 sps:$4 sm:$0xff]  }
 0x4bc   :  { %v2134_v54 = vpop.f32.mrb[14].mxu0 }
 0x4bd   :  { %v2135_v55 = vadd.f32 %v4514_v53, %v2134_v54  ;;  %v4926_v51 = vpop.f32.mrb[15].mxu0  ;;  %v5456_v53 = vld [vmem:[%s7495_s12 + $0x2e0] ss:$28 sps:$4 sm:$0xff]   ;;  %v5461_v54 = vld [vmem:[%s7495_s12 + $0x314] ss:$28 sps:$4 sm:$0xff]  }
 0x4be   :  { %v5459_v51 = vld [vmem:[%s7495_s12 + $0x310] ss:$28 sps:$4 sm:$0xff]  }
 0x4bf   :  { %v2138_v57 = vmax.f32 %v2135_v55, 0.0  ;;  %v5464_v55 = vld [vmem:[%s7495_s12 + $0x31c] ss:$28 sps:$4 sm:$0xff]  }
 0x4c1   :  { %v2139_v62 = vpack.c.bf16 %v2138_v57, %v2138_v57  ;;  %v5462_v57 = vld [vmem:[%s7495_s12 + $0x318] ss:$28 sps:$4 sm:$0xff]  }
 0x4c3   :  { %2387 = vmatmul.mubr.bf16.vlgmr.msra.gmra.mrb[8].mxu1 %v2139_v62  ;;  %2428 = vmatmul.mubr.bf16.vlgmr.msra.gmra.mrb[16].mxu0 %v2139_v62  ;;  %v5465_v62 = vld [vmem:[%s7495_s12 + $0x348] ss:$28 sps:$4 sm:$0xff]  }
 0x4c4   :  { %3890 = vmatpush1.bf16.msra.mxu1 %v5375_v60  ;;  %3972 = vmatpush1.bf16.msra.mxu0 %v5378_v61  ;;  %v5467_v60 = vld [vmem:[%s7495_s12 + $0x34c] ss:$28 sps:$4 sm:$0xff]   ;;  %v5470_v61 = vld [vmem:[%s7495_s12 + $0x354] ss:$28 sps:$4 sm:$0xff]  }
 0x4c5   :  { %3891 = vmatprep.subr.bf16.mxu1 %v5383_v1  ;;  %3973 = vmatprep.subr.bf16.mxu0 %v5386_v2  ;;  %v5468_v1 = vld [vmem:[%s7495_s12 + $0x350] ss:$28 sps:$4 sm:$0xff]   ;;  %v5473_v2 = vld [vmem:[%s7495_s12 + $0x384] ss:$28 sps:$4 sm:$0xff]  }
 0x4c8   :  { %3892 = vmatpush1.bf16.msra.mxu1 %v5381_v3  ;;  %3974 = vmatpush1.bf16.msra.mxu0 %v5384_v4  ;;  %v5476_v3 = vld [vmem:[%s7495_s12 + $0x38c] ss:$28 sps:$4 sm:$0xff]   ;;  %v6940_v4 = vld [vmem:[%s7494_s11] sm:$0xf] }
 0x4c9   :  { %3893 = vmatprep.subr.bf16.mxu1 %v5389_v5  ;;  %3975 = vmatprep.subr.bf16.mxu0 %v5392_v6  ;;  %v2177_v5 = vrot.slane %v6940_v4, %v6548_v58  ;;  %v2181_v6 = vrot.slane %v6940_v4, %v6551_v59 }
 0x4cc   :  { %3894 = vmatpush1.bf16.msra.mxu1 %v5387_v7  ;;  %3976 = vmatpush1.bf16.msra.mxu0 %v5390_v8  ;;  %v2189_v7 = vrot.slane %v6940_v4, %v6562_v0 }
 0x4cd   :  { %3895 = vmatprep.subr.bf16.mxu1 %v5395_v9  ;;  %3977 = vmatprep.subr.bf16.mxu0 %v5398_v10 }
 0x4d0   :  { %3896 = vmatpush1.bf16.msra.mxu1 %v5393_v11  ;;  %3978 = vmatpush1.bf16.msra.mxu0 %v5396_v12 }
 0x4d1   :  { %3897 = vmatprep.subr.bf16.mxu1 %v5401_v13  ;;  %3979 = vmatprep.subr.bf16.mxu0 %v5404_v14 }
 0x4d4   :  { %3898 = vmatpush1.bf16.msra.mxu1 %v5399_v15  ;;  %3980 = vmatpush1.bf16.msra.mxu0 %v5402_v16 }
 0x4d5   :  { %3899 = vmatprep.subr.bf16.mxu1 %v5407_v18  ;;  %3981 = vmatprep.subr.bf16.mxu0 %v5410_v19 }
 0x4d8   :  { %3900 = vmatpush1.bf16.msra.mxu1 %v5405_v20  ;;  %3982 = vmatpush1.bf16.msra.mxu0 %v5408_v21 }
 0x4d9   :  { %3901 = vmatprep.subr.bf16.mxu1 %v5413_v22  ;;  %3983 = vmatprep.subr.bf16.mxu0 %v5416_v23 }
 0x4dc   :  { %3902 = vmatpush1.bf16.msra.mxu1 %v5411_v24  ;;  %3984 = vmatpush1.bf16.msra.mxu0 %v5414_v25  ;;  %v5471_v24 = vld [vmem:[%s7495_s12 + $0x380] ss:$28 sps:$4 sm:$0xff]   ;;  %v5474_v25 = vld [vmem:[%s7495_s12 + $0x388] ss:$28 sps:$4 sm:$0xff]  }
 0x4dd   :  { %3903 = vmatprep.subr.bf16.mxu1 %v5419_v26  ;;  %3985 = vmatprep.subr.bf16.mxu0 %v5422_v27  ;;  %v5479_v27 = vld [vmem:[%s7495_s12 + $0x3bc] ss:$28 sps:$4 sm:$0xff]  }
 0x4e0   :  { %3904 = vmatpush1.bf16.msra.mxu1 %v5417_v28  ;;  %3986 = vmatpush1.bf16.msra.mxu0 %v5420_v29  ;;  %v5482_v28 = vld [vmem:[%s7495_s12 + $0x3c4] ss:$28 sps:$4 sm:$0xff]  }
 0x4e1   :  { %3905 = vmatprep.subr.bf16.mxu1 %v5425_v30  ;;  %3987 = vmatprep.subr.bf16.mxu0 %v5428_v31  ;;  %v5477_v30 = vld [vmem:[%s7495_s12 + $0x3b8] ss:$28 sps:$4 sm:$0xff]   ;;  %v5480_v31 = vld [vmem:[%s7495_s12 + $0x3c0] ss:$28 sps:$4 sm:$0xff]  }
 0x4e4   :  { %3906 = vmatpush1.bf16.msra.mxu1 %v5423_v32  ;;  %3988 = vmatpush1.bf16.msra.mxu0 %v5426_v33  ;;  %v5485_v32 = vld [vmem:[%s7495_s12 + $0x3f4] ss:$28 sps:$4 sm:$0xff]   ;;  %v5488_v33 = vld [vmem:[%s7495_s12 + $0x3fc] ss:$28 sps:$4 sm:$0xff]  }
 0x4e5   :  { %3907 = vmatprep.subr.bf16.mxu1 %v5431_v34  ;;  %3989 = vmatprep.subr.bf16.mxu0 %v5434_v35  ;;  %v5483_v34 = vld [vmem:[%s7495_s12 + $0x3f0] ss:$28 sps:$4 sm:$0xff]   ;;  %v5486_v35 = vld [vmem:[%s7495_s12 + $0x3f8] ss:$28 sps:$4 sm:$0xff]  }
 0x4e8   :  { %3908 = vmatpush1.bf16.msra.mxu1 %v5429_v36  ;;  %3990 = vmatpush1.bf16.msra.mxu0 %v5432_v37  ;;  %v5491_v36 = vld [vmem:[%s7495_s12 + $0x42c] ss:$28 sps:$4 sm:$0xff]   ;;  %v5494_v37 = vld [vmem:[%s7495_s12 + $0x434] ss:$28 sps:$4 sm:$0xff]  }
 0x4e9   :  { %3909 = vmatprep.subr.bf16.mxu1 %v5437_v38  ;;  %3991 = vmatprep.subr.bf16.mxu0 %v5440_v39  ;;  %v5489_v38 = vld [vmem:[%s7495_s12 + $0x428] ss:$28 sps:$4 sm:$0xff]   ;;  %v5492_v39 = vld [vmem:[%s7495_s12 + $0x430] ss:$28 sps:$4 sm:$0xff]  }
 0x4ec   :  { %3910 = vmatpush1.bf16.msra.mxu1 %v5435_v17  ;;  %3992 = vmatpush1.bf16.msra.mxu0 %v5438_v40  ;;  %v5497_v17 = vld [vmem:[%s7495_s12 + $0x464] ss:$28 sps:$4 sm:$0xff]   ;;  %v5500_v40 = vld [vmem:[%s7495_s12 + $0x46c] ss:$28 sps:$4 sm:$0xff]  }
 0x4ed   :  { %3911 = vmatprep.subr.bf16.mxu1 %v5443_v41  ;;  %3993 = vmatprep.subr.bf16.mxu0 %v5446_v42  ;;  %v5495_v41 = vld [vmem:[%s7495_s12 + $0x460] ss:$28 sps:$4 sm:$0xff]   ;;  %v5498_v42 = vld [vmem:[%s7495_s12 + $0x468] ss:$28 sps:$4 sm:$0xff]  }
 0x4f0   :  { %3912 = vmatpush1.bf16.msra.mxu1 %v5441_v43  ;;  %3994 = vmatpush1.bf16.msra.mxu0 %v5444_v44  ;;  %v5503_v43 = vld [vmem:[%s7495_s12 + $0x49c] ss:$28 sps:$4 sm:$0xff]   ;;  %v5506_v44 = vld [vmem:[%s7495_s12 + $0x4a4] ss:$28 sps:$4 sm:$0xff]  }
 0x4f1   :  { %3913 = vmatprep.subr.bf16.mxu1 %v5449_v45  ;;  %3995 = vmatprep.subr.bf16.mxu0 %v5452_v46  ;;  %v5501_v45 = vld [vmem:[%s7495_s12 + $0x498] ss:$28 sps:$4 sm:$0xff]   ;;  %v5504_v46 = vld [vmem:[%s7495_s12 + $0x4a0] ss:$28 sps:$4 sm:$0xff]  }
 0x4f4   :  { %3914 = vmatpush1.bf16.msra.mxu1 %v5447_v47  ;;  %3996 = vmatpush1.bf16.msra.mxu0 %v5450_v48  ;;  %v5509_v47 = vld [vmem:[%s7495_s12 + $0x4d4] ss:$28 sps:$4 sm:$0xff]   ;;  %v5512_v48 = vld [vmem:[%s7495_s12 + $0x4dc] ss:$28 sps:$4 sm:$0xff]  }
 0x4f5   :  { %3915 = vmatprep.subr.bf16.mxu1 %v5455_v49  ;;  %3997 = vmatprep.subr.bf16.mxu0 %v5458_v50  ;;  %v5507_v49 = vld [vmem:[%s7495_s12 + $0x4d0] ss:$28 sps:$4 sm:$0xff]   ;;  %v5510_v50 = vld [vmem:[%s7495_s12 + $0x4d8] ss:$28 sps:$4 sm:$0xff]  }
 0x4f8   :  { %3916 = vmatpush1.bf16.msra.mxu1 %v5453_v52  ;;  %3998 = vmatpush1.bf16.msra.mxu0 %v5456_v53  ;;  %v5515_v52 = vld [vmem:[%s7495_s12 + $0x50c] ss:$28 sps:$4 sm:$0xff]   ;;  %v5518_v53 = vld [vmem:[%s7495_s12 + $0x514] ss:$28 sps:$4 sm:$0xff]  }
 0x4f9   :  { %3917 = vmatprep.subr.bf16.mxu1 %v5461_v54  ;;  %3999 = vmatprep.subr.bf16.mxu0 %v5464_v55  ;;  %v5513_v54 = vld [vmem:[%s7495_s12 + $0x508] ss:$28 sps:$4 sm:$0xff]   ;;  %v5516_v55 = vld [vmem:[%s7495_s12 + $0x510] ss:$28 sps:$4 sm:$0xff]  }
 0x4fc   :  { %3918 = vmatpush1.bf16.msra.mxu1 %v5459_v51  ;;  %4000 = vmatpush1.bf16.msra.mxu0 %v5462_v57  ;;  %v5521_v51 = vld [vmem:[%s7495_s12 + $0x544] ss:$28 sps:$4 sm:$0xff]   ;;  %v5524_v57 = vld [vmem:[%s7495_s12 + $0x54c] ss:$28 sps:$4 sm:$0xff]  }
 0x4fd   :  { %3919 = vmatprep.subr.bf16.mxu1 %v5467_v60  ;;  %4001 = vmatprep.subr.bf16.mxu0 %v5470_v61  ;;  %v5519_v60 = vld [vmem:[%s7495_s12 + $0x540] ss:$28 sps:$4 sm:$0xff]   ;;  %v5522_v61 = vld [vmem:[%s7495_s12 + $0x548] ss:$28 sps:$4 sm:$0xff]  }
 0x500   :  { %3920 = vmatpush1.bf16.msra.mxu1 %v5465_v62  ;;  %4002 = vmatpush1.bf16.msra.mxu0 %v5468_v1  ;;  %v5527_v62 = vld [vmem:[%s7495_s12 + $0x57c] ss:$28 sps:$4 sm:$0xff]   ;;  %v5530_v1 = vld [vmem:[%s7495_s12 + $0x584] ss:$28 sps:$4 sm:$0xff]  }
 0x501   :  { %3930 = vmatprep.subr.bf16.mxu1 %v5473_v2  ;;  %4012 = vmatprep.subr.bf16.mxu0 %v5476_v3  ;;  %v5525_v2 = vld [vmem:[%s7495_s12 + $0x578] ss:$28 sps:$4 sm:$0xff]   ;;  %v5528_v3 = vld [vmem:[%s7495_s12 + $0x580] ss:$28 sps:$4 sm:$0xff]  }
 0x596   :  { %v2388_v8 = vpop.f32.mrb[8].mxu1  ;;  %v6948_v9 = vpop.f32.mrb[16].mxu0 }
 0x597   :  { %v2389_v10 = vadd.f32 %v2388_v8, %v2177_v5  ;;  %v2390_v11 = vpop.f32.mrb[9].mxu1  ;;  %v2431_v12 = vpop.f32.mrb[17].mxu0  ;;  %v5533_v5 = vld [vmem:[%s7495_s12 + $0x5b4] ss:$28 sps:$4 sm:$0xff]  }
 0x598   :  { %v2391_v13 = vadd.f32 %v2390_v11, %v2181_v6  ;;  %v2432_v14 = vadd.f32 %v2431_v12, %v2189_v7  ;;  %v2392_v15 = vpop.f32.mrb[10].mxu1  ;;  %v2433_v16 = vpop.f32.mrb[18].mxu0  ;;  %v5536_v6 = vld [vmem:[%s7495_s12 + $0x5bc] ss:$28 sps:$4 sm:$0xff]   ;;  %v5531_v7 = vld [vmem:[%s7495_s12 + $0x5b0] ss:$28 sps:$4 sm:$0xff]  }
 0x599   :  { %v2436_v18 = vmax.f32 %v2389_v10, 0.0  ;;  %v2393_v19 = vpop.f32.mrb[11].mxu1  ;;  %v2434_v20 = vpop.f32.mrb[19].mxu0  ;;  %v5534_v8 = vld [vmem:[%s7495_s12 + $0x5b8] ss:$28 sps:$4 sm:$0xff]  }
 0x59a   :  { %v2437_v21 = vmax.f32 %v2391_v13, 0.0  ;;  %v2439_v22 = vmax.f32 %v2432_v14, 0.0  ;;  %v5539_v10 = vld [vmem:[%s7495_s12 + $0x5ec] ss:$28 sps:$4 sm:$0xff]   ;;  %v5542_v11 = vld [vmem:[%s7495_s12 + $0x5f4] ss:$28 sps:$4 sm:$0xff]  }
 0x59b   :  { %v6958_v26 = vpack.c.bf16 %v2436_v18, %v2436_v18  ;;  %v5537_v12 = vld [vmem:[%s7495_s12 + $0x5e8] ss:$28 sps:$4 sm:$0xff]   ;;  %v5540_v13 = vld [vmem:[%s7495_s12 + $0x5f0] ss:$28 sps:$4 sm:$0xff]   ;;  %v5543_v16 = vld [vmem:[%s7495_s12 + $0x620] ss:$28 sps:$4 sm:$0xff]  }
 0x59c   :  { %v6950_v23 = vpack.c.bf16 %v2437_v21, %v2437_v21  ;;  %v6968_v29 = vpack.c.bf16 %v2439_v22, %v2439_v22  ;;  %v5545_v14 = vld [vmem:[%s7495_s12 + $0x624] ss:$28 sps:$4 sm:$0xff]   ;;  %v5548_v15 = vld [vmem:[%s7495_s12 + $0x62c] ss:$28 sps:$4 sm:$0xff]   ;;  %v5551_v19 = vld [vmem:[%s7495_s12 + $0x65c] ss:$28 sps:$4 sm:$0xff]  }
 0x59d   :  { %v5546_v18 = vld [vmem:[%s7495_s12 + $0x628] ss:$28 sps:$4 sm:$0xff]   ;;  %v5549_v21 = vld [vmem:[%s7495_s12 + $0x658] ss:$28 sps:$4 sm:$0xff]   ;;  %v5552_v22 = vld [vmem:[%s7495_s12 + $0x660] ss:$28 sps:$4 sm:$0xff]  }
 0x59e   :  { %3921 = vmatprep.mubr.bf16.mxu1 %v6950_v23  ;;  %4003 = vmatprep.mubr.bf16.mxu0 %v6950_v23  ;;  %v5554_v20 = vld [vmem:[%s7495_s12 + $0x664] ss:$28 sps:$4 sm:$0xff]  }
 0x59f   :  { %3922 = vmatmul.mubr.bf16.vlgmr.msra.gmra.mrb[12].mxu1 %v6958_v26  ;;  %4004 = vmatmul.mubr.bf16.vlgmr.msra.gmra.mrb[20].mxu0 %v6958_v26 }
 0x5a0   :  { %3931 = vmatpush1.bf16.msra.mxu1 %v5471_v24  ;;  %4013 = vmatpush1.bf16.msra.mxu0 %v5474_v25  ;;  %v2185_v24 = vrot.slane %v6940_v4, %v6559_v63  ;;  %v5557_v25 = vld [vmem:[%s7495_s12 + $0x694] ss:$28 sps:$4 sm:$0xff]  }
 0x5a1   :  { %3962 = vmatprep.mubr.bf16.mxu1 %v6968_v29  ;;  %4044 = vmatprep.mubr.bf16.mxu0 %v6968_v29  ;;  %v5558_v4 = vld [vmem:[%s7495_s12 + $0x698] ss:$28 sps:$4 sm:$0xff]  }
 0x5a2   :  { %3932 = vmatprep.subr.bf16.mxu1 %v5479_v27  ;;  %4014 = vmatprep.subr.bf16.mxu0 %v5482_v28  ;;  %v5560_v27 = vld [vmem:[%s7495_s12 + $0x69c] ss:$28 sps:$4 sm:$0xff]   ;;  %v5555_v28 = vld [vmem:[%s7495_s12 + $0x690] ss:$28 sps:$4 sm:$0xff]  }
 0x5a4   :  { %3933 = vmatpush1.bf16.msra.mxu1 %v5477_v30  ;;  %4015 = vmatpush1.bf16.msra.mxu0 %v5480_v31  ;;  %v2430_v30 = vadd.f32 %v6948_v9, %v2185_v24  ;;  %v5563_v31 = vld [vmem:[%s7495_s12 + $0x6cc] ss:$28 sps:$4 sm:$0xff]   ;;  %v5625_v24 = vld [vmem:[%s7495_s12 + $0x600] ss:$28 sps:$4 sm:$0xff]  }
 0x5a5   :  { %3934 = vmatprep.subr.bf16.mxu1 %v5485_v32  ;;  %4016 = vmatprep.subr.bf16.mxu0 %v5488_v33  ;;  %v5566_v32 = vld [vmem:[%s7495_s12 + $0x6d4] ss:$28 sps:$4 sm:$0xff]   ;;  %v5561_v33 = vld [vmem:[%s7495_s12 + $0x6c8] ss:$28 sps:$4 sm:$0xff]  }
 0x5a6   :  { %v5564_v9 = vld [vmem:[%s7495_s12 + $0x6d0] ss:$28 sps:$4 sm:$0xff]  }
 0x5a8   :  { %3935 = vmatpush1.bf16.msra.mxu1 %v5483_v34  ;;  %4017 = vmatpush1.bf16.msra.mxu0 %v5486_v35  ;;  %v2438_v34 = vmax.f32 %v2430_v30, 0.0  ;;  %v5569_v35 = vld [vmem:[%s7495_s12 + $0x14] ss:$28 sps:$4 sm:$0xff]  }
 0x5a9   :  { %3936 = vmatprep.subr.bf16.mxu1 %v5491_v36  ;;  %4018 = vmatprep.subr.bf16.mxu0 %v5494_v37  ;;  %v5570_v36 = vld [vmem:[%s7495_s12 + $0x1d8] ss:$28 sps:$4 sm:$0xff]   ;;  %v5567_v37 = vld [vmem:[%s7495_s12 + $0x10] ss:$28 sps:$4 sm:$0xff]  }
 0x5aa   :  { %v5627_v30 = vld [vmem:[%s7495_s12 + $0x2b0] ss:$28 sps:$4 sm:$0xff]  }
 0x5ac   :  { %3937 = vmatpush1.bf16.msra.mxu1 %v5489_v38  ;;  %4019 = vmatpush1.bf16.msra.mxu0 %v5492_v39  ;;  %v7160_v38 = vpack.c.bf16 %v2438_v34, %v2438_v34  ;;  %v5571_v39 = vld [vmem:[%s7495_s12 + $0x18] ss:$28 sps:$4 sm:$0xff]   ;;  %v5636_v34 = vld [vmem:[%s7495_s12 + $0x4b0] ss:$28 sps:$4 sm:$0xff]  }
 0x5ad   :  { %3938 = vmatprep.subr.bf16.mxu1 %v5497_v17  ;;  %4020 = vmatprep.subr.bf16.mxu0 %v5500_v40  ;;  %v5574_v17 = vld [vmem:[%s7495_s12 + $0x4c] ss:$28 sps:$4 sm:$0xff]  }
 0x5ae   :  { %v5575_v40 = vld [vmem:[%s7495_s12 + $0x210] ss:$28 sps:$4 sm:$0xff]  }
 0x5b0   :  { %3939 = vmatpush1.bf16.msra.mxu1 %v5495_v41  ;;  %4021 = vmatpush1.bf16.msra.mxu0 %v5498_v42  ;;  %v5572_v41 = vld [vmem:[%s7495_s12 + $0x48] ss:$28 sps:$4 sm:$0xff]   ;;  %v5576_v42 = vld [vmem:[%s7495_s12 + $0x50] ss:$28 sps:$4 sm:$0xff]  }
 0x5b1   :  { %3940 = vmatprep.subr.bf16.mxu1 %v5503_v43  ;;  %4022 = vmatprep.subr.bf16.mxu0 %v5506_v44  ;;  %v5579_v43 = vld [vmem:[%s7495_s12 + $0x84] ss:$28 sps:$4 sm:$0xff]  }
 0x5b2   :  { %v5580_v44 = vld [vmem:[%s7495_s12 + $0x248] ss:$28 sps:$4 sm:$0xff]  }
 0x5b4   :  { %3941 = vmatpush1.bf16.msra.mxu1 %v5501_v45  ;;  %4023 = vmatpush1.bf16.msra.mxu0 %v5504_v46  ;;  %v5577_v45 = vld [vmem:[%s7495_s12 + $0x80] ss:$28 sps:$4 sm:$0xff]  }
 0x5b5   :  { %3942 = vmatprep.subr.bf16.mxu1 %v5509_v47  ;;  %4024 = vmatprep.subr.bf16.mxu0 %v5512_v48  ;;  %v5584_v46 = vld [vmem:[%s7495_s12 + $0xbc] ss:$28 sps:$4 sm:$0xff]  }
 0x5b6   :  { %v5585_v47 = vld [vmem:[%s7495_s12 + $0x280] ss:$28 sps:$4 sm:$0xff]   ;;  %v5582_v48 = vld [vmem:[%s7495_s12 + $0xb8] ss:$28 sps:$4 sm:$0xff]  }
 0x5b8   :  { %3943 = vmatpush1.bf16.msra.mxu1 %v5507_v49  ;;  %4025 = vmatpush1.bf16.msra.mxu0 %v5510_v50  ;;  %v5586_v49 = vld [vmem:[%s7495_s12 + $0xc0] ss:$28 sps:$4 sm:$0xff]   ;;  %v5589_v50 = vld [vmem:[%s7495_s12 + $0xf4] ss:$28 sps:$4 sm:$0xff]  }
 0x5b9   :  { %3944 = vmatprep.subr.bf16.mxu1 %v5515_v52  ;;  %4026 = vmatprep.subr.bf16.mxu0 %v5518_v53  ;;  %v5590_v52 = vld [vmem:[%s7495_s12 + $0x2b8] ss:$28 sps:$4 sm:$0xff]   ;;  %v5587_v53 = vld [vmem:[%s7495_s12 + $0xf0] ss:$28 sps:$4 sm:$0xff]  }
 0x5bc   :  { %3945 = vmatpush1.bf16.msra.mxu1 %v5513_v54  ;;  %4027 = vmatpush1.bf16.msra.mxu0 %v5516_v55  ;;  %v5591_v54 = vld [vmem:[%s7495_s12 + $0xf8] ss:$28 sps:$4 sm:$0xff]   ;;  %v5594_v55 = vld [vmem:[%s7495_s12 + $0x12c] ss:$28 sps:$4 sm:$0xff]  }
 0x5bd   :  { %3946 = vmatprep.subr.bf16.mxu1 %v5521_v51  ;;  %4028 = vmatprep.subr.bf16.mxu0 %v5524_v57  ;;  %v5595_v51 = vld [vmem:[%s7495_s12 + $0x2f0] ss:$28 sps:$4 sm:$0xff]   ;;  %v5592_v57 = vld [vmem:[%s7495_s12 + $0x128] ss:$28 sps:$4 sm:$0xff]  }
 0x5c0   :  { %3947 = vmatpush1.bf16.msra.mxu1 %v5519_v60  ;;  %4029 = vmatpush1.bf16.msra.mxu0 %v5522_v61  ;;  %v5596_v60 = vld [vmem:[%s7495_s12 + $0x130] ss:$28 sps:$4 sm:$0xff]   ;;  %v5599_v61 = vld [vmem:[%s7495_s12 + $0x164] ss:$28 sps:$4 sm:$0xff]  }
 0x5c1   :  { %3948 = vmatprep.subr.bf16.mxu1 %v5527_v62  ;;  %4030 = vmatprep.subr.bf16.mxu0 %v5530_v1  ;;  %v5600_v62 = vld [vmem:[%s7495_s12 + $0x328] ss:$28 sps:$4 sm:$0xff]   ;;  %v5597_v1 = vld [vmem:[%s7495_s12 + $0x160] ss:$28 sps:$4 sm:$0xff]  }
 0x5c4   :  { %3949 = vmatpush1.bf16.msra.mxu1 %v5525_v2  ;;  %4031 = vmatpush1.bf16.msra.mxu0 %v5528_v3  ;;  %v5601_v2 = vld [vmem:[%s7495_s12 + $0x168] ss:$28 sps:$4 sm:$0xff]   ;;  %v5604_v3 = vld [vmem:[%s7495_s12 + $0x19c] ss:$28 sps:$4 sm:$0xff]  }
 0x5c5   :  { %3950 = vmatprep.subr.bf16.mxu1 %v5533_v5  ;;  %4032 = vmatprep.subr.bf16.mxu0 %v5536_v6  ;;  %v5605_v5 = vld [vmem:[%s7495_s12 + $0x360] ss:$28 sps:$4 sm:$0xff]   ;;  %v5602_v6 = vld [vmem:[%s7495_s12 + $0x198] ss:$28 sps:$4 sm:$0xff]  }
 0x5c8   :  { %3951 = vmatpush1.bf16.msra.mxu1 %v5531_v7  ;;  %4033 = vmatpush1.bf16.msra.mxu0 %v5534_v8  ;;  %v5606_v7 = vld [vmem:[%s7495_s12 + $0x1a0] ss:$28 sps:$4 sm:$0xff]   ;;  %v5609_v8 = vld [vmem:[%s7495_s12 + $0x1d4] ss:$28 sps:$4 sm:$0xff]  }
 0x5c9   :  { %3952 = vmatprep.subr.bf16.mxu1 %v5539_v10  ;;  %4034 = vmatprep.subr.bf16.mxu0 %v5542_v11  ;;  %v5610_v10 = vld [vmem:[%s7495_s12 + $0x558] ss:$28 sps:$4 sm:$0xff]   ;;  %v5607_v11 = vld [vmem:[%s7495_s12 + $0x1d0] ss:$28 sps:$4 sm:$0xff]  }
 0x5cc   :  { %3953 = vmatpush1.bf16.msra.mxu1 %v5537_v12  ;;  %4035 = vmatpush1.bf16.msra.mxu0 %v5540_v13  ;;  %v5611_v12 = vld [vmem:[%s7495_s12 + $0x398] ss:$28 sps:$4 sm:$0xff]   ;;  %v5614_v13 = vld [vmem:[%s7495_s12 + $0x20c] ss:$28 sps:$4 sm:$0xff]  }
 0x5cd   :  { %3954 = vmatprep.subr.bf16.mxu1 %v5545_v14  ;;  %4036 = vmatprep.subr.bf16.mxu0 %v5548_v15  ;;  %v5615_v14 = vld [vmem:[%s7495_s12 + $0x590] ss:$28 sps:$4 sm:$0xff]   ;;  %v5612_v15 = vld [vmem:[%s7495_s12 + $0x208] ss:$28 sps:$4 sm:$0xff]  }
 0x5d0   :  { %3955 = vmatpush1.bf16.msra.mxu1 %v5543_v16  ;;  %4037 = vmatpush1.bf16.msra.mxu0 %v5546_v18  ;;  %v5616_v16 = vld [vmem:[%s7495_s12 + $0x3d0] ss:$28 sps:$4 sm:$0xff]   ;;  %v5619_v18 = vld [vmem:[%s7495_s12 + $0x244] ss:$28 sps:$4 sm:$0xff]  }
 0x5d1   :  { %3956 = vmatprep.subr.bf16.mxu1 %v5551_v19  ;;  %4038 = vmatprep.subr.bf16.mxu0 %v5554_v20  ;;  %v5620_v19 = vld [vmem:[%s7495_s12 + $0x5c8] ss:$28 sps:$4 sm:$0xff]   ;;  %v5617_v20 = vld [vmem:[%s7495_s12 + $0x240] ss:$28 sps:$4 sm:$0xff]  }
 0x5d4   :  { %3957 = vmatpush1.bf16.msra.mxu1 %v5549_v21  ;;  %4039 = vmatpush1.bf16.msra.mxu0 %v5552_v22  ;;  %v5621_v21 = vld [vmem:[%s7495_s12 + $0x408] ss:$28 sps:$4 sm:$0xff]   ;;  %v5624_v22 = vld [vmem:[%s7495_s12 + $0x27c] ss:$28 sps:$4 sm:$0xff]  }
 0x5d5   :  { %3958 = vmatprep.subr.bf16.mxu1 %v5557_v25  ;;  %4040 = vmatprep.subr.bf16.mxu0 %v5560_v27  ;;  %v5622_v25 = vld [vmem:[%s7495_s12 + $0x278] ss:$28 sps:$4 sm:$0xff]   ;;  %v5626_v27 = vld [vmem:[%s7495_s12 + $0x440] ss:$28 sps:$4 sm:$0xff]  }
 0x5d8   :  { %3959 = vmatpush1.bf16.msra.mxu1 %v5555_v28  ;;  %4041 = vmatpush1.bf16.msra.mxu0 %v5558_v4  ;;  %v5629_v28 = vld [vmem:[%s7495_s12 + $0x2b4] ss:$28 sps:$4 sm:$0xff]  }
 0x5d9   :  { %3960 = vmatprep.subr.bf16.mxu1 %v5563_v31  ;;  %4042 = vmatprep.subr.bf16.mxu0 %v5566_v32  ;;  %v5630_v4 = vld [vmem:[%s7495_s12 + $0x638] ss:$28 sps:$4 sm:$0xff]   ;;  %v5634_v32 = vld [vmem:[%s7495_s12 + $0x2ec] ss:$28 sps:$4 sm:$0xff]  }
 0x5da   :  { %v5631_v31 = vld [vmem:[%s7495_s12 + $0x478] ss:$28 sps:$4 sm:$0xff]  }
 0x5dc   :  { %3961 = vmatpush1.bf16.msra.mxu1 %v5561_v33  ;;  %4043 = vmatpush1.bf16.msra.mxu0 %v5564_v9  ;;  %v5635_v33 = vld [vmem:[%s7495_s12 + $0x670] ss:$28 sps:$4 sm:$0xff]   ;;  %v5632_v9 = vld [vmem:[%s7495_s12 + $0x2e8] ss:$28 sps:$4 sm:$0xff]  }
 0x5dd   :  { %4053 = vmatprep.subr.bf16.mxu1 %v5569_v35  ;;  %4843 = vmatprep.subr.bf16.mxu0 %v5570_v36  ;;  %v5639_v35 = vld [vmem:[%s7495_s12 + $0x324] ss:$28 sps:$4 sm:$0xff]  }
 0x5de   :  { %v5640_v36 = vld [vmem:[%s7495_s12 + $0x6a8] ss:$28 sps:$4 sm:$0xff]  }
 0x5df   :  { %3963 = vmatmul.mubr.bf16.vlgmr.msra.gmra.mrb[12].mxu1 %v7160_v38  ;;  %4045 = vmatmul.mubr.bf16.vlgmr.msra.gmra.mrb[20].mxu0 %v7160_v38 }
 0x5e0   :  { %4054 = vmatpush1.bf16.msra.mxu1 %v5567_v37  ;;  %4085 = vmatprep.mubr.bf16.mxu1 %v6950_v23  ;;  %v5637_v37 = vld [vmem:[%s7495_s12 + $0x320] ss:$28 sps:$4 sm:$0xff]  }
 0x5e1   :  { %4844 = vmatpush3.bf16.msra.mxu0 %v5571_v39  ;;  %4167 = vmatprep.mubr.bf16.mxu0 %v6950_v23  ;;  %v5581_v23 = vld [vmem:[%s7495_s12 + $0x88] ss:$28 sps:$4 sm:$0xff]  }
 0x5e2   :  { %4055 = vmatprep.subr.bf16.mxu1 %v5574_v17  ;;  %4845 = vmatprep.subr.bf16.mxu0 %v5575_v40  ;;  %v5641_v39 = vld [vmem:[%s7495_s12 + $0x4e8] ss:$28 sps:$4 sm:$0xff]   ;;  %v5644_v17 = vld [vmem:[%s7495_s12 + $0x35c] ss:$28 sps:$4 sm:$0xff]  }
 0x5e3   :  { %v5645_v40 = vld [vmem:[%s7495_s12 + $0x6e0] ss:$28 sps:$4 sm:$0xff]  }
 0x5e4   :  { %4056 = vmatpush1.bf16.msra.mxu1 %v5572_v41  ;;  %v5642_v41 = vld [vmem:[%s7495_s12 + $0x358] ss:$28 sps:$4 sm:$0xff]  }
 0x5e5   :  { %4846 = vmatpush3.bf16.msra.mxu0 %v5576_v42  ;;  %4057 = vmatprep.subr.bf16.mxu1 %v5579_v43  ;;  %v5646_v42 = vld [vmem:[%s7495_s12 + $0x520] ss:$28 sps:$4 sm:$0xff]   ;;  %v5649_v43 = vld [vmem:[%s7495_s12 + $0x394] ss:$28 sps:$4 sm:$0xff]  }
 0x5e6   :  { %4847 = vmatprep.subr.bf16.mxu0 %v5580_v44  ;;  %v5647_v44 = vld [vmem:[%s7495_s12 + $0x390] ss:$28 sps:$4 sm:$0xff]  }
 0x5e8   :  { %4058 = vmatpush1.bf16.msra.mxu1 %v5577_v45  ;;  %v5652_v45 = vld [vmem:[%s7495_s12 + $0x3cc] ss:$28 sps:$4 sm:$0xff]  }
 0x5e9   :  { %4848 = vmatpush3.bf16.msra.mxu0 %v5581_v23  ;;  %4059 = vmatprep.subr.bf16.mxu1 %v5584_v46  ;;  %v5650_v23 = vld [vmem:[%s7495_s12 + $0x3c8] ss:$28 sps:$4 sm:$0xff]  }
 0x5ea   :  { %4849 = vmatprep.subr.bf16.mxu0 %v5585_v47  ;;  %v5655_v46 = vld [vmem:[%s7495_s12 + $0x404] ss:$28 sps:$4 sm:$0xff]  }
 0x5eb   :  { %v5653_v47 = vld [vmem:[%s7495_s12 + $0x400] ss:$28 sps:$4 sm:$0xff]  }
 0x5ec   :  { %4060 = vmatpush1.bf16.msra.mxu1 %v5582_v48  ;;  %v5661_v48 = vld [vmem:[%s7495_s12 + $0x474] ss:$28 sps:$4 sm:$0xff]  }
 0x5ed   :  { %4850 = vmatpush3.bf16.msra.mxu0 %v5586_v49  ;;  %4061 = vmatprep.subr.bf16.mxu1 %v5589_v50  ;;  %v5659_v49 = vld [vmem:[%s7495_s12 + $0x470] ss:$28 sps:$4 sm:$0xff]  }
 0x5ee   :  { %4851 = vmatprep.subr.bf16.mxu0 %v5590_v52  ;;  %v5664_v50 = vld [vmem:[%s7495_s12 + $0x4ac] ss:$28 sps:$4 sm:$0xff]  }
 0x5ef   :  { %v5662_v52 = vld [vmem:[%s7495_s12 + $0x4a8] ss:$28 sps:$4 sm:$0xff]  }
 0x5f0   :  { %4062 = vmatpush1.bf16.msra.mxu1 %v5587_v53  ;;  %v5667_v53 = vld [vmem:[%s7495_s12 + $0x4e4] ss:$28 sps:$4 sm:$0xff]  }
 0x5f1   :  { %4852 = vmatpush3.bf16.msra.mxu0 %v5591_v54  ;;  %4063 = vmatprep.subr.bf16.mxu1 %v5594_v55  ;;  %v5665_v54 = vld [vmem:[%s7495_s12 + $0x4e0] ss:$28 sps:$4 sm:$0xff]  }
 0x5f2   :  { %4853 = vmatprep.subr.bf16.mxu0 %v5595_v51  ;;  %v5670_v55 = vld [vmem:[%s7495_s12 + $0x51c] ss:$28 sps:$4 sm:$0xff]  }
 0x5f3   :  { %v5668_v51 = vld [vmem:[%s7495_s12 + $0x518] ss:$28 sps:$4 sm:$0xff]  }
 0x5f4   :  { %4064 = vmatpush1.bf16.msra.mxu1 %v5592_v57  ;;  %v5673_v57 = vld [vmem:[%s7495_s12 + $0x554] ss:$28 sps:$4 sm:$0xff]  }
 0x5f5   :  { %4854 = vmatpush3.bf16.msra.mxu0 %v5596_v60  ;;  %4065 = vmatprep.subr.bf16.mxu1 %v5599_v61  ;;  %v5671_v60 = vld [vmem:[%s7495_s12 + $0x550] ss:$28 sps:$4 sm:$0xff]  }
 0x5f6   :  { %4855 = vmatprep.subr.bf16.mxu0 %v5600_v62  ;;  %v5676_v61 = vld [vmem:[%s7495_s12 + $0x58c] ss:$28 sps:$4 sm:$0xff]  }
 0x5f7   :  { %v5674_v62 = vld [vmem:[%s7495_s12 + $0x588] ss:$28 sps:$4 sm:$0xff]  }
 0x5f8   :  { %4066 = vmatpush1.bf16.msra.mxu1 %v5597_v1  ;;  %v5679_v1 = vld [vmem:[%s7495_s12 + $0x5c4] ss:$28 sps:$4 sm:$0xff]  }
 0x5f9   :  { %4856 = vmatpush3.bf16.msra.mxu0 %v5601_v2  ;;  %4067 = vmatprep.subr.bf16.mxu1 %v5604_v3  ;;  %v5677_v2 = vld [vmem:[%s7495_s12 + $0x5c0] ss:$28 sps:$4 sm:$0xff]  }
 0x5fa   :  { %4857 = vmatprep.subr.bf16.mxu0 %v5605_v5  ;;  %v5682_v3 = vld [vmem:[%s7495_s12 + $0x5fc] ss:$28 sps:$4 sm:$0xff]  }
 0x5fb   :  { %v5680_v5 = vld [vmem:[%s7495_s12 + $0x5f8] ss:$28 sps:$4 sm:$0xff]  }
 0x5fc   :  { %4068 = vmatpush1.bf16.msra.mxu1 %v5602_v6  ;;  %v5685_v6 = vld [vmem:[%s7495_s12 + $0x634] ss:$28 sps:$4 sm:$0xff]  }
 0x5fd   :  { %4858 = vmatpush3.bf16.msra.mxu0 %v5606_v7  ;;  %4069 = vmatprep.subr.bf16.mxu1 %v5609_v8  ;;  %v5683_v7 = vld [vmem:[%s7495_s12 + $0x630] ss:$28 sps:$4 sm:$0xff]  }
 0x5fe   :  { %4865 = vmatprep.subr.bf16.mxu0 %v5610_v10  ;;  %v5688_v8 = vld [vmem:[%s7495_s12 + $0x66c] ss:$28 sps:$4 sm:$0xff]  }
 0x5ff   :  { %v5686_v10 = vld [vmem:[%s7495_s12 + $0x668] ss:$28 sps:$4 sm:$0xff]  }
 0x600   :  { %4168 = vmatmul.mubr.bf16.vlgmr.msra.gmra.mrb[24].mxu0 %v6958_v26  ;;  %4070 = vmatpush1.bf16.msra.mxu1 %v5607_v11  ;;  %v5691_v11 = vld [vmem:[%s7495_s12 + $0x6a4] ss:$28 sps:$4 sm:$0xff]  }
 0x601   :  { %4866 = vmatpush3.bf16.msra.mxu0 %v5611_v12  ;;  %4207 = vmatprep.mubr.bf16.mxu0 %v6968_v29  ;;  %v5689_v12 = vld [vmem:[%s7495_s12 + $0x6a0] ss:$28 sps:$4 sm:$0xff]  }
 0x602   :  { %4071 = vmatprep.subr.bf16.mxu1 %v5614_v13  ;;  %4867 = vmatprep.subr.bf16.mxu0 %v5615_v14  ;;  %v5694_v13 = vld [vmem:[%s7495_s12 + $0x6dc] ss:$28 sps:$4 sm:$0xff]  }
 0x603   :  { %v5692_v14 = vld [vmem:[%s7495_s12 + $0x6d8] ss:$28 sps:$4 sm:$0xff]  }
 0x604   :  { %4072 = vmatpush1.bf16.msra.mxu1 %v5612_v15  ;;  %v7454_v15 = vld [vmem:[%s7496_s13] sm:$0x7f] }
 0x605   :  { %4868 = vmatpush3.bf16.msra.mxu0 %v5616_v16  ;;  %4073 = vmatprep.subr.bf16.mxu1 %v5619_v18  ;;  %v2705_v16 = vrot.slane %v7454_v15, %v6548_v58  ;;  %v2713_v18 = vrot.slane %v7454_v15, %v6559_v63 }
 0x606   :  { %4869 = vmatprep.subr.bf16.mxu0 %v5620_v19  ;;  %v2709_v19 = vrot.slane %v7454_v15, %v6551_v59 }
 0x608   :  { %4074 = vmatpush1.bf16.msra.mxu1 %v5617_v20  ;;  %v2717_v20 = vrot.slane %v7454_v15, %v6562_v0 }
 0x609   :  { %4870 = vmatpush3.bf16.msra.mxu0 %v5621_v21  ;;  %4075 = vmatprep.subr.bf16.mxu1 %v5624_v22 }
 0x60a   :  { %4871 = vmatprep.subr.bf16.mxu0 %v5625_v24 }
 0x60c   :  { %4076 = vmatpush1.bf16.msra.mxu1 %v5622_v25 }
 0x60d   :  { %4872 = vmatpush3.bf16.msra.mxu0 %v5626_v27  ;;  %4077 = vmatprep.subr.bf16.mxu1 %v5629_v28 }
 0x60e   :  { %4873 = vmatprep.subr.bf16.mxu0 %v5630_v4 }
 0x610   :  { %4078 = vmatpush1.bf16.msra.mxu1 %v5627_v30 }
 0x611   :  { %4874 = vmatpush3.bf16.msra.mxu0 %v5631_v31  ;;  %4079 = vmatprep.subr.bf16.mxu1 %v5634_v32 }
 0x612   :  { %4875 = vmatprep.subr.bf16.mxu0 %v5635_v33 }
 0x614   :  { %4080 = vmatpush1.bf16.msra.mxu1 %v5632_v9 }
 0x615   :  { %4876 = vmatpush3.bf16.msra.mxu0 %v5636_v34  ;;  %4081 = vmatprep.subr.bf16.mxu1 %v5639_v35 }
 0x616   :  { %4877 = vmatprep.subr.bf16.mxu0 %v5640_v36 }
 0x618   :  { %4082 = vmatpush1.bf16.msra.mxu1 %v5637_v37 }
 0x619   :  { %4878 = vmatpush3.bf16.msra.mxu0 %v5641_v39  ;;  %4083 = vmatprep.subr.bf16.mxu1 %v5644_v17 }
 0x61a   :  { %4879 = vmatprep.subr.bf16.mxu0 %v5645_v40 }
 0x61c   :  { %4084 = vmatpush1.bf16.msra.mxu1 %v5642_v41 }
 0x61d   :  { %4880 = vmatpush3.bf16.msra.mxu0 %v5646_v42  ;;  %4094 = vmatprep.subr.bf16.mxu1 %v5649_v43 }
 0x61f   :  { %4086 = vmatmul.mubr.bf16.vlgmr.msra.gmra.mrb[16].mxu1 %v6958_v26  ;;  %v5658_v26 = vld [vmem:[%s7495_s12 + $0x43c] ss:$28 sps:$4 sm:$0xff]  }
 0x620   :  { %4208 = vmatmul.mubr.bf16.vlgmr.msra.gmra.mrb[28].mxu0 %v7160_v38  ;;  %4095 = vmatpush1.bf16.msra.mxu1 %v5647_v44 }
 0x621   :  { %4126 = vmatprep.mubr.bf16.mxu1 %v6968_v29  ;;  %4096 = vmatprep.subr.bf16.mxu1 %v5652_v45  ;;  %v5656_v29 = vld [vmem:[%s7495_s12 + $0x438] ss:$28 sps:$4 sm:$0xff]   ;;  %s5754_s12 = smov [#allocation2]  }
 0x622   :  { %s4270_s13 = sshll.u32 %s5754_s12, 4  ;;  %s4271_s13 = int_to_ptr.vmem [resolvable:$true] %s4270_s13 }
 0x623   :  { %s5725_s7 = scalar_lea.vmem %s4271_s13, 896  ;;  %p5730_p1 = scmp.lt.s32.totalorder %s4271_s13, %s4271_s13 }
 0x624   :  { %4097 = vmatpush1.bf16.msra.mxu1 %v5650_v23  ;;  %p5726_p0 = scmp.ne.s32.totalorder %s4271_s13, %s5725_s7  ;;  %p5731_p2 = scmp.lt.s32.totalorder %s5725_s7, %s5725_s7 }
 0x625   :  { %4098 = vmatprep.subr.bf16.mxu1 %v5655_v46 }
 0x626   :  { %p5732_p3 = por %p5731_p2, %p5730_p1 }
 0x628   :  { %4099 = vmatpush1.bf16.msra.mxu1 %v5653_v47  ;;  %p5733_p4 = pnand %p5732_p3, %p5726_p0 }
 0x629   :  { %4100 = vmatprep.subr.bf16.mxu1 %v5658_v26 }
 0x62c   :  { %4101 = vmatpush1.bf16.msra.mxu1 %v5656_v29  ;;  %v2728_v29 = vsub.s32 6, %v6545_v56 }
 0x62d   :  { %4102 = vmatprep.subr.bf16.mxu1 %v5661_v48 }
 0x62e   :  { %v2729_v48 = vrot.slane %v7454_v15, %v2728_v29 }
 0x630   :  { %4103 = vmatpush1.bf16.msra.mxu1 %v5659_v49 }
 0x631   :  { %4104 = vmatprep.subr.bf16.mxu1 %v5664_v50 }
 0x634   :  { %4105 = vmatpush1.bf16.msra.mxu1 %v5662_v52 }
 0x635   :  { %4106 = vmatprep.subr.bf16.mxu1 %v5667_v53 }
 0x638   :  { %4107 = vmatpush1.bf16.msra.mxu1 %v5665_v54 }
 0x639   :  { %4108 = vmatprep.subr.bf16.mxu1 %v5670_v55 }
 0x63c   :  { %4109 = vmatpush1.bf16.msra.mxu1 %v5668_v51 }
 0x63d   :  { %4110 = vmatprep.subr.bf16.mxu1 %v5673_v57 }
 0x640   :  { %4111 = vmatpush1.bf16.msra.mxu1 %v5671_v60 }
 0x641   :  { %4112 = vmatprep.subr.bf16.mxu1 %v5676_v61 }
 0x644   :  { %4113 = vmatpush1.bf16.msra.mxu1 %v5674_v62 }
 0x645   :  { %4114 = vmatprep.subr.bf16.mxu1 %v5679_v1  ;;  %v2720_v1 = vsub.s32 4, %v6545_v56 }
 0x648   :  { %4115 = vmatpush1.bf16.msra.mxu1 %v5677_v2  ;;  %v2724_v2 = vsub.s32 5, %v6545_v56 }
 0x649   :  { %4116 = vmatprep.subr.bf16.mxu1 %v5682_v3  ;;  %v2721_v3 = vrot.slane %v7454_v15, %v2720_v1 }
 0x64c   :  { %4117 = vmatpush1.bf16.msra.mxu1 %v5680_v5  ;;  %v2725_v5 = vrot.slane %v7454_v15, %v2724_v2 }
 0x64d   :  { %4118 = vmatprep.subr.bf16.mxu1 %v5685_v6 }
 0x650   :  { %4119 = vmatpush1.bf16.msra.mxu1 %v5683_v7 }
 0x651   :  { %4120 = vmatprep.subr.bf16.mxu1 %v5688_v8 }
 0x654   :  { %4121 = vmatpush1.bf16.msra.mxu1 %v5686_v10 }
 0x655   :  { %4122 = vmatprep.subr.bf16.mxu1 %v5691_v11 }
 0x658   :  { %4123 = vmatpush1.bf16.msra.mxu1 %v5689_v12 }
 0x659   :  { %4124 = vmatprep.subr.bf16.mxu1 %v5694_v13 }
 0x65c   :  { %4125 = vmatpush1.bf16.msra.mxu1 %v5692_v14 }
 0x65f   :  { %4127 = vmatmul.mubr.bf16.vlgmr.msra.gmra.mrb[16].mxu1 %v7160_v38 }
 0x6b2   :  { %v3964_v21 = vpop.f32.mrb[12].mxu1  ;;  %v4046_v22 = vpop.f32.mrb[20].mxu0 }
 0x6b3   :  { %v4957_v38 = vadd.f32 %v3964_v21, %v2705_v16  ;;  %v4959_v24 = vadd.f32 %v4046_v22, %v2713_v18  ;;  %v3966_v25 = vpop.f32.mrb[13].mxu1  ;;  %v4048_v27 = vpop.f32.mrb[21].mxu0 }
 0x6b4   :  { %v4958_v28 = vadd.f32 %v3966_v25, %v2709_v19  ;;  %v4960_v4 = vadd.f32 %v4048_v27, %v2717_v20  ;;  %v3968_v30 = vpop.f32.mrb[14].mxu1  ;;  %v4050_v31 = vpop.f32.mrb[22].mxu0 }
 0x6b5   :  { %v4773_v58 = vmul.f32 -1.442695, %v4957_v38  ;;  %v4775_v32 = vmul.f32 -1.442695, %v4959_v24  ;;  %v3969_v33 = vpop.f32.mrb[15].mxu1  ;;  %v4051_v63 = vpop.f32.mrb[23].mxu0 }
 0x6b6   :  { %v4774_v9 = vmul.f32 -1.442695, %v4958_v28  ;;  %v4776_v34 = vmul.f32 -1.442695, %v4960_v4 }
 0x6b7   :  { %5697 = vpow2.f32 %v4773_v58 }
 0x6b8   :  { %5699 = vpow2.f32 %v4775_v32 }
 0x6b9   :  { %5701 = vpow2.f32 %v4774_v9 }
 0x6ba   :  { %5703 = vpow2.f32 %v4776_v34 }
 0x6c1   :  { %v5698_v59 = vpop.eup %5697 }
 0x6c2   :  { %v5700_v0 = vpop.eup %5699  ;;  %v4236_v35 = vadd.f32 1.0, %v5698_v59 }
 0x6c3   :  { %v5702_v36 = vpop.eup %5701  ;;  %v4238_v37 = vadd.f32 1.0, %v5700_v0 }
 0x6c4   :  { %v5704_v39 = vpop.eup %5703  ;;  %5705 = vrcp.f32 %v4236_v35  ;;  %v4237_v17 = vadd.f32 1.0, %v5702_v36 }
 0x6c5   :  { %5707 = vrcp.f32 %v4238_v37  ;;  %v4239_v40 = vadd.f32 1.0, %v5704_v39 }
 0x6c6   :  { %5709 = vrcp.f32 %v4237_v17 }
 0x6c7   :  { %5711 = vrcp.f32 %v4239_v40 }
 0x6ce   :  { %v5706_v41 = vpop.eup %5705 }
 0x6cf   :  { %v5708_v42 = vpop.eup %5707  ;;  %4257 = vst [vmem:[#allocation2] sm:$0xff] %v5706_v41 }
 0x6d0   :  { %v5710_v43 = vpop.eup %5709  ;;  %4259 = vst [vmem:[#allocation2 + $0x10] sm:$0xff] %v5708_v42 }
 0x6d1   :  { %v5712_v44 = vpop.eup %5711  ;;  %4258 = vst [vmem:[#allocation2 + $0x8] sm:$0xff] %v5710_v43 }
 0x6d2   :  { %4260 = vst [vmem:[#allocation2 + $0x18] sm:$0xff] %v5712_v44 }
 0x6d3   :  { %v4859_v45 = vpop.f32.mrb[24].mxu0 }
 0x6d4   :  { %v4860_v23 = vpop.f32.mrb[25].mxu0 }
 0x6d5   :  { %v4861_v46 = vadd.f32 %v4860_v23, %v4859_v45  ;;  %v4862_v47 = vpop.f32.mrb[26].mxu0 }
 0x6d6   :  { %v4863_v26 = vpop.f32.mrb[27].mxu0 }
 0x6d7   :  { %v4170_v52 = vadd.f32 %v4861_v46, %v2729_v48 }
 0x6f3   :  { %v4881_v49 = vpop.f32.mrb[28].mxu0 }
 0x6f4   :  { %v4882_v50 = vpop.f32.mrb[29].mxu0 }
 0x6f5   :  { %v4883_v53 = vadd.f32 %v4882_v50, %v4881_v49  ;;  %v4884_v54 = vpop.f32.mrb[30].mxu0 }
 0x6f6   :  { %v4885_v55 = vpop.f32.mrb[31].mxu0 }
 0x6f7   :  { %v4210_v51 = vadd.f32 %v4883_v53, %v4170_v52 }
 0x6f9   :  { %v4779_v57 = vmul.f32 -1.442695, %v4210_v51 }
 0x6fb   :  { %5713 = vpow2.f32 %v4779_v57 }
 0x705   :  { %v5714_v60 = vpop.eup %5713 }
 0x706   :  { %v4242_v61 = vadd.f32 1.0, %v5714_v60 }
 0x708   :  { %5715 = vrcp.f32 %v4242_v61 }
 0x712   :  { %v5716_v62 = vpop.eup %5715 }
 0x713   :  { %4263 = vst.msk [vmem:[#allocation2 + $0x30] sm:$0xff] %vm1263_vm0, %v5716_v62 }
 0x732   :  { %v4128_v6 = vpop.f32.mrb[16].mxu1 }
 0x733   :  { %v4961_v7 = vadd.f32 %v4128_v6, %v2721_v3  ;;  %v4130_v8 = vpop.f32.mrb[17].mxu1 }
 0x734   :  { %v4962_v10 = vadd.f32 %v4130_v8, %v2725_v5  ;;  %v4132_v11 = vpop.f32.mrb[18].mxu1 }
 0x735   :  { %v4777_v12 = vmul.f32 -1.442695, %v4961_v7  ;;  %v4133_v13 = vpop.f32.mrb[19].mxu1 }
 0x736   :  { %v4778_v14 = vmul.f32 -1.442695, %v4962_v10 }
 0x737   :  { %5717 = vpow2.f32 %v4777_v12 }
 0x738   :  { %5719 = vpow2.f32 %v4778_v14 }
 0x741   :  { %v5718_v16 = vpop.eup %5717 }
 0x742   :  { %v5720_v18 = vpop.eup %5719  ;;  %v4240_v19 = vadd.f32 1.0, %v5718_v16 }
 0x743   :  { %v4241_v20 = vadd.f32 1.0, %v5720_v18 }
 0x744   :  { %5721 = vrcp.f32 %v4240_v19 }
 0x745   :  { %5723 = vrcp.f32 %v4241_v20 }
 0x74e   :  { %v5722_v56 = vpop.eup %5721 }
 0x74f   :  { %v5724_v15 = vpop.eup %5723  ;;  %4261 = vst [vmem:[#allocation2 + $0x20] sm:$0xff] %v5722_v56 }
 0x750   :  { %4262 = vst [vmem:[#allocation2 + $0x28] sm:$0xff] %v5724_v15 }
 0x751   :  { %5736 = shalt.err (!%p5733_p4)
}
 0x752   :  { %s5737_s19 = scalar_lea.hbm %s7497_s14, 896 }
 0x753   :  { %p5738_p5 = scmp.ne.s32.totalorder %s7497_s14, %s5737_s19  ;;  %p5741_p6 = scmp.lt.u32.totalorder %s5737_s19, %s7497_s14 }
 0x755   :  { %p5743_p7 = pnand %p5741_p6, %p5738_p5 }
 0x757   :  { %5746 = shalt.err (!%p5743_p7)
}
 0x758   :  { %4273 = dma.vmem_to_hbm [thread:$0]  %s4271_s13, 896, %s7497_s14, [#allocation3]  }
 0x759   :  { %5747 = dma.done.wait [#allocation3], 896  }
 0x75a   :  { %5748 = vsyncadd [#allocation3], 4294966400 }
 0x75b   :  { %4281 = vsyncpa [#allocation3], 1 }

</bundles_post_ra>
